<compile_context>
chip_gen: v7x
topology: tpu7x:2x2x1
jax: 0.10.0
libtpu: 0.0.40
codegen_flags: <defaults>
</compile_context>

<pallas_src>
import jax
import jax.numpy as jnp
from jax.experimental import pallas as pl
from jax.experimental.pallas import tpu as pltpu

LANE = 128
MATMUL_DTYPE = jnp.bfloat16          # set to jnp.float32 for exact-f32 parity checks
_VMEM_LIMIT = 48 * 1024 * 1024
_TILE_CAP = 512                      # pooled-output rows per grid step (scaled inputs)
_FUSE_HEADS_MAX_ROWS = 4096          # last block stays single-block below this


def _round_up(n, m):
    return ((n + m - 1) // m) * m


def _pick_tile(n, cap=_TILE_CAP):
    """Largest tile <= cap that divides n (multiple of 8), else the full n."""
    if n <= cap or n % 8:
        return n
    t = cap - cap % 8
    while n % t:
        t -= 8
    return t


# ----------------------------------------------------------------------------
# Pallas kernels
# ----------------------------------------------------------------------------
def conv_block_kernel(p_ref, w_ref, b_ref, scale_ref, shift_ref, o_ref):
    """Conv(k,'same') + bias + ReLU + BatchNorm(eval) + MaxPool(2), one M-tile.

    p_ref:     (4, TM, Kp)  bf16 im2col patches; leading dim = 2x2 pool phase,
                            rows = (batch, pooled pixel), aligned across phases.
    w_ref:     (Kp, Cp)     bf16 flattened conv weight (zero padded).
    b_ref/scale_ref/shift_ref: (1, Cp) f32 conv bias / BN scale / BN shift.
    o_ref:     (TM, Cp)     f32 pooled block output.
    """
    _, TM, Kp = p_ref.shape
    Cp = o_ref.shape[-1]
    p = p_ref[...].reshape(4 * TM, Kp)
    # One MXU matmul covering all 4 pool phases of this row tile.
    y = jnp.dot(p, w_ref[...], preferred_element_type=jnp.float32)
    y = jnp.maximum(y + b_ref[...], 0.0)             # conv bias + ReLU
    y = y * scale_ref[...] + shift_ref[...]          # BN(eval) affine, pre-pool (sign safe)
    y = y.reshape(4, TM, Cp)
    o_ref[...] = jnp.maximum(jnp.maximum(y[0], y[1]), jnp.maximum(y[2], y[3]))


def last_block_heads_kernel(p_ref, w_ref, b_ref, scale_ref, shift_ref,
                            w1_ref, b1_ref, w2_ref, b2_ref, o_ref):
    """Last conv block + global average pool + both MLP heads (dropout = id).

    p_ref: (4, B*N, Kp) bf16 patches.   w1: (Cp, 2H) bf16, w2: (2H, Op) bf16.
    o_ref: (B, Op) f32 = [sem logits | poisonous logit | zero padding].
    """
    _, BN, Kp = p_ref.shape
    Cp = w_ref.shape[1]
    B = o_ref.shape[0]
    N = BN // B

    p = p_ref[...].reshape(4 * BN, Kp)
    y = jnp.dot(p, w_ref[...], preferred_element_type=jnp.float32)
    y = jnp.maximum(y + b_ref[...], 0.0)
    y = y * scale_ref[...] + shift_ref[...]
    y = y.reshape(4, BN, Cp)
    feat = jnp.maximum(jnp.maximum(y[0], y[1]), jnp.maximum(y[2], y[3]))   # (BN, Cp)

    g = jnp.mean(feat.reshape(B, N, Cp), axis=1)                           # global avg pool
    h = jnp.dot(g.astype(w1_ref.dtype), w1_ref[...],
                preferred_element_type=jnp.float32) + b1_ref[...]
    h = jnp.maximum(h, 0.0)
    o_ref[...] = (jnp.dot(h.astype(w2_ref.dtype), w2_ref[...],
                          preferred_element_type=jnp.float32) + b2_ref[...])


def heads_kernel(feat_ref, w1_ref, b1_ref, w2_ref, b2_ref, o_ref):
    """Fallback heads kernel (only used when the last block is too large to fuse)."""
    g = jnp.mean(feat_ref[...], axis=1)
    h = jnp.maximum(jnp.dot(g.astype(w1_ref.dtype), w1_ref[...],
                            preferred_element_type=jnp.float32) + b1_ref[...], 0.0)
    o_ref[...] = (jnp.dot(h.astype(w2_ref.dtype), w2_ref[...],
                          preferred_element_type=jnp.float32) + b2_ref[...])


# ----------------------------------------------------------------------------
# JAX wrappers (im2col, padding/packing, pallas_call plumbing)
# ----------------------------------------------------------------------------
def _im2col_pool_phases(x, k):
    """x: (B,H,W,C) real channels only -> ((4, B*Ho*Wo, k*k*C) f32 patches, Ho, Wo)."""
    B, H, W, C = x.shape
    assert H % 2 == 0 and W % 2 == 0, "spatial dims must be even (MaxPool2d(2))"
    Ho, Wo = H // 2, W // 2
    pad = (k - 1) // 2
    K = k * k * C
    xp = jnp.pad(x, ((0, 0), (pad, pad), (pad, pad), (0, 0)))
    pats = [xp[:, ky:ky + H, kx:kx + W, :] for ky in range(k) for kx in range(k)]
    pat = jnp.stack(pats, axis=3).reshape(B, H, W, K)
    # Group the four 2x2 max-pool phases first; batch*out-pixel rows aligned across phases.
    pat = pat.reshape(B, Ho, 2, Wo, 2, K).transpose(2, 4, 0, 1, 3, 5)
    return pat.reshape(4, B * Ho * Wo, K), Ho, Wo


def _pack_conv_operands(x, w, b, scale, shift):
    """Slice x to the REAL input channels (no padded-K carry), build bf16 padded
    patches/weights and f32 epilogue row-vectors."""
    k, _, Cin, Cout = w.shape
    x = x[..., :Cin]                             # drop lane padding from the previous block
    pat, Ho, Wo = _im2col_pool_phases(x, k)
    K = pat.shape[-1]
    Kp = _round_up(K, LANE)
    Cp = _round_up(Cout, LANE)
    pat = jnp.pad(pat, ((0, 0), (0, 0), (0, Kp - K))).astype(MATMUL_DTYPE)
    wp = jnp.pad(w.reshape(K, Cout), ((0, Kp - K), (0, Cp - Cout))).astype(MATMUL_DTYPE)
    bp = jnp.pad(b, (0, Cp - Cout)).reshape(1, Cp)
    sc = jnp.pad(scale, (0, Cp - Cout)).reshape(1, Cp)
    sh = jnp.pad(shift, (0, Cp - Cout)).reshape(1, Cp)
    return pat, wp, bp, sc, sh, Ho, Wo, Cp


def conv_block(x, lp):
    """One encoder block. Returns (B, H//2, W//2, Cp) with padded channels = 0."""
    B = x.shape[0]
    pat, wp, bp, sc, sh, Ho, Wo, Cp = _pack_conv_operands(
        x, lp['w'], lp['b'], lp['scale'], lp['shift'])
    BN = B * Ho * Wo
    Kp = pat.shape[-1]
    TM = _pick_tile(BN)
    out = pl.pallas_call(
        conv_block_kernel,
        grid=(BN // TM,),
        in_specs=[
            pl.BlockSpec((4, TM, Kp), lambda i: (0, i, 0)),
            pl.BlockSpec((Kp, Cp), lambda i: (0, 0)),
            pl.BlockSpec((1, Cp), lambda i: (0, 0)),
            pl.BlockSpec((1, Cp), lambda i: (0, 0)),
            pl.BlockSpec((1, Cp), lambda i: (0, 0)),
        ],
        out_specs=pl.BlockSpec((TM, Cp), lambda i: (i, 0)),
        out_shape=jax.ShapeDtypeStruct((BN, Cp), jnp.float32),
        compiler_params=pltpu.CompilerParams(
            dimension_semantics=("parallel",),      # lights up both v7x TensorCores
            vmem_limit_bytes=_VMEM_LIMIT),
    )(pat, wp, bp, sc, sh)
    return out.reshape(B, Ho, Wo, Cp)


def _pack_head_operands(params, Cp):
    """Merge the two MLP heads: one concatenated first layer + block-diagonal second."""
    C = params['sem_w1'].shape[0]           # real encoder channel count
    Hh = params['sem_w1'].shape[1]          # hidden width (128)
    num_semcls = params['sem_w2'].shape[1]
    Op = _round_up(num_semcls + 1, LANE)
    w1 = jnp.zeros((Cp, 2 * Hh), jnp.float32)
    w1 = w1.at[:C, :Hh].set(params['sem_w1'])
    w1 = w1.at[:C, Hh:].set(params['poi_w1'])
    b1 = jnp.concatenate([params['sem_b1'], params['poi_b1']]).reshape(1, 2 * Hh)
    w2 = jnp.zeros((2 * Hh, Op), jnp.float32)
    w2 = w2.at[:Hh, :num_semcls].set(params['sem_w2'])
    w2 = w2.at[Hh:, num_semcls:num_semcls + 1].set(params['poi_w2'])
    b2 = jnp.zeros((1, Op), jnp.float32)
    b2 = b2.at[0, :num_semcls].set(params['sem_b2'])
    b2 = b2.at[0, num_semcls:num_semcls + 1].set(params['poi_b2'])
    return w1.astype(MATMUL_DTYPE), b1, w2.astype(MATMUL_DTYPE), b2, Op, num_semcls


def last_block_and_heads(x, lp, params):
    """Last encoder block fused with global-avg-pool + both MLP heads."""
    B, H, W, _ = x.shape
    BN = B * (H // 2) * (W // 2)
    Cp = _round_up(lp['w'].shape[3], LANE)
    w1, b1, w2, b2, Op, num_semcls = _pack_head_operands(params, Cp)

    if BN <= _FUSE_HEADS_MAX_ROWS:
        pat, wp, bp, sc, sh, _, _, Cp = _pack_conv_operands(
            x, lp['w'], lp['b'], lp['scale'], lp['shift'])
        out = pl.pallas_call(
            last_block_heads_kernel,
            out_shape=jax.ShapeDtypeStruct((B, Op), jnp.float32),
            compiler_params=pltpu.CompilerParams(vmem_limit_bytes=_VMEM_LIMIT),
        )(pat, wp, bp, sc, sh, w1, b1, w2, b2)
    else:
        # Scaled-input fallback: gridded conv block, then a small heads kernel.
        feat = conv_block(x, lp).reshape(B, (H // 2) * (W // 2), Cp)
        out = pl.pallas_call(
            heads_kernel,
            out_shape=jax.ShapeDtypeStruct((B, Op), jnp.float32),
            compiler_params=pltpu.CompilerParams(vmem_limit_bytes=_VMEM_LIMIT),
        )(feat, w1, b1, w2, b2)
    return {'sem_cls_head': out[:, :num_semcls],
            'poisonous_head': out[:, num_semcls:num_semcls + 1]}


@jax.jit
def mhcnn_forward(x, params):
    h = x
    for lp in params['conv'][:-1]:
        h = conv_block(h, lp)
    # All Dropout layers are identity in eval mode.
    return last_block_and_heads(h, params['conv'][-1], params)


# ----------------------------------------------------------------------------
# Deterministic parameter init (Xavier uniform, zero bias, BN defaults) — eval mode
# ----------------------------------------------------------------------------
def _xavier(key, shape, fan_in, fan_out):
    a = float(jnp.sqrt(6.0 / (fan_in + fan_out)))
    return jax.random.uniform(key, shape, jnp.float32, -a, a)


def init_params(key, in_channels=3, base_channels=8, num_layers=3, k=3, num_semcls=10):
    eps = 1e-5
    params = {'conv': []}
    cur = in_channels
    for i in range(num_layers):
        cout = base_channels * 2 ** i
        key, wk = jax.random.split(key)
        w = _xavier(wk, (k, k, cur, cout), cur * k * k, cout * k * k)
        b = jnp.zeros((cout,), jnp.float32)
        gamma = jnp.ones((cout,), jnp.float32)       # BN init per _initialize_weights
        beta = jnp.zeros((cout,), jnp.float32)
        run_mean = jnp.zeros((cout,), jnp.float32)   # PyTorch BN running-stat defaults
        run_var = jnp.ones((cout,), jnp.float32)
        scale = gamma / jnp.sqrt(run_var + eps)
        shift = beta - run_mean * scale
        params['conv'].append(dict(w=w, b=b, scale=scale, shift=shift))
        cur = cout
    key, k1, k2, k3, k4 = jax.random.split(key, 5)
    params['sem_w1'] = _xavier(k1, (cur, 128), cur, 128)
    params['sem_b1'] = jnp.zeros((128,), jnp.float32)
    params['sem_w2'] = _xavier(k2, (128, num_semcls), 128, num_semcls)
    params['sem_b2'] = jnp.zeros((num_semcls,), jnp.float32)
    params['poi_w1'] = _xavier(k3, (cur, 128), cur, 128)
    params['poi_b1'] = jnp.zeros((128,), jnp.float32)
    params['poi_w2'] = _xavier(k4, (128, 1), 128, 1)
    params['poi_b2'] = jnp.zeros((1,), jnp.float32)
    return params


if __name__ == "__main__":
    key = jax.random.PRNGKey(0)
    pkey, xkey = jax.random.split(key)
    # small config: in_channels=3, base_channels=8, num_layers=3, num_semcls=10
    params = init_params(pkey, in_channels=3, base_channels=8, num_layers=3,
                         k=3, num_semcls=10)
    x = jax.random.normal(xkey, (2, 16, 16, 3), jnp.float32)   # NHWC input

    outs = jax.block_until_ready(mhcnn_forward(x, params))

    assert outs['sem_cls_head'].shape == (2, 10)
    assert outs['poisonous_head'].shape == (2, 1)
    assert bool(jnp.all(jnp.isfinite(outs['sem_cls_head'])))
    assert bool(jnp.all(jnp.isfinite(outs['poisonous_head'])))
    print("KERNEL_OK")
</pallas_src>

<mosaic_0001>
module attributes {stable_mosaic.version = 11 : i64} {
  func.func @conv_block_kernel(%arg0: i32, %arg1: memref<4x128x128xbf16, #tpu.memory_space<vmem>>, %arg2: memref<128x128xbf16, #tpu.memory_space<vmem>>, %arg3: memref<1x128xf32, #tpu.memory_space<vmem>>, %arg4: memref<1x128xf32, #tpu.memory_space<vmem>>, %arg5: memref<1x128xf32, #tpu.memory_space<vmem>>, %arg6: memref<128x128xf32, #tpu.memory_space<vmem>>) attributes {dimension_semantics = [#tpu.dimension_semantics<parallel>], iteration_bounds = array<i64: 1>, scalar_prefetch = 0 : i64, scratch_operands = 0 : i64, tpu.core_type = #tpu.core_type<tc>, window_params = [{transform_indices = @transform_0, window_bounds = array<i64: 4, 128, 128>}, {pipeline_mode = #tpu.pipeline_mode<synchronous>, transform_indices = @transform_1, window_bounds = array<i64: 128, 128>}, {pipeline_mode = #tpu.pipeline_mode<synchronous>, transform_indices = @transform_2, window_bounds = array<i64: 1, 128>}, {pipeline_mode = #tpu.pipeline_mode<synchronous>, transform_indices = @transform_3, window_bounds = array<i64: 1, 128>}, {pipeline_mode = #tpu.pipeline_mode<synchronous>, transform_indices = @transform_4, window_bounds = array<i64: 1, 128>}, {transform_indices = @transform_5, window_bounds = array<i64: 128, 128>}]} {
    %c0 = arith.constant 0 : index
    %c0_0 = arith.constant 0 : index
    %c0_1 = arith.constant 0 : index
    %0 = vector.load %arg1[%c0, %c0_0, %c0_1] : memref<4x128x128xbf16, #tpu.memory_space<vmem>>, vector<4x128x128xbf16>
    %1 = vector.shape_cast %0 : vector<4x128x128xbf16> to vector<512x128xbf16>
    %c0_2 = arith.constant 0 : index
    %c0_3 = arith.constant 0 : index
    %2 = vector.load %arg2[%c0_2, %c0_3] : memref<128x128xbf16, #tpu.memory_space<vmem>>, vector<128x128xbf16>
    %cst = arith.constant dense<0.000000e+00> : vector<512x128xf32>
    %3 = tpu.matmul %1, %2, %cst {dimension_numbers = #tpu.dot_dimension_numbers<[1], [0], [0], [1], [0, 0, 1, 1], [], []>} : vector<512x128xbf16>, vector<128x128xbf16>, vector<512x128xf32> -> vector<512x128xf32>
    %c0_4 = arith.constant 0 : index
    %c0_5 = arith.constant 0 : index
    %4 = vector.load %arg3[%c0_4, %c0_5] : memref<1x128xf32, #tpu.memory_space<vmem>>, vector<1x128xf32>
    %5 = vector.broadcast %4 : vector<1x128xf32> to vector<512x128xf32>
    %6 = arith.addf %3, %5 : vector<512x128xf32>
    %cst_6 = arith.constant 0.000000e+00 : f32
    %7 = vector.broadcast %cst_6 : f32 to vector<512x128xf32>
    %8 = arith.maximumf %6, %7 : vector<512x128xf32>
    %c0_7 = arith.constant 0 : index
    %c0_8 = arith.constant 0 : index
    %9 = vector.load %arg4[%c0_7, %c0_8] : memref<1x128xf32, #tpu.memory_space<vmem>>, vector<1x128xf32>
    %10 = vector.broadcast %9 : vector<1x128xf32> to vector<512x128xf32>
    %11 = arith.mulf %8, %10 : vector<512x128xf32>
    %c0_9 = arith.constant 0 : index
    %c0_10 = arith.constant 0 : index
    %12 = vector.load %arg5[%c0_9, %c0_10] : memref<1x128xf32, #tpu.memory_space<vmem>>, vector<1x128xf32>
    %13 = vector.broadcast %12 : vector<1x128xf32> to vector<512x128xf32>
    %14 = arith.addf %11, %13 : vector<512x128xf32>
    %15 = vector.shape_cast %14 : vector<512x128xf32> to vector<4x128x128xf32>
    %16 = vector.extract_strided_slice %15 {offsets = [0, 0, 0], sizes = [1, 128, 128], strides = [1, 1, 1]} : vector<4x128x128xf32> to vector<1x128x128xf32>
    %17 = vector.shape_cast %16 : vector<1x128x128xf32> to vector<128x128xf32>
    %18 = vector.extract_strided_slice %15 {offsets = [1, 0, 0], sizes = [1, 128, 128], strides = [1, 1, 1]} : vector<4x128x128xf32> to vector<1x128x128xf32>
    %19 = vector.shape_cast %18 : vector<1x128x128xf32> to vector<128x128xf32>
    %20 = arith.maximumf %17, %19 : vector<128x128xf32>
    %21 = vector.extract_strided_slice %15 {offsets = [2, 0, 0], sizes = [1, 128, 128], strides = [1, 1, 1]} : vector<4x128x128xf32> to vector<1x128x128xf32>
    %22 = vector.shape_cast %21 : vector<1x128x128xf32> to vector<128x128xf32>
    %23 = vector.extract_strided_slice %15 {offsets = [3, 0, 0], sizes = [1, 128, 128], strides = [1, 1, 1]} : vector<4x128x128xf32> to vector<1x128x128xf32>
    %24 = vector.shape_cast %23 : vector<1x128x128xf32> to vector<128x128xf32>
    %25 = arith.maximumf %22, %24 : vector<128x128xf32>
    %26 = arith.maximumf %20, %25 : vector<128x128xf32>
    %c0_11 = arith.constant 0 : index
    %c0_12 = arith.constant 0 : index
    %27 = vector.load %arg6[%c0_11, %c0_12] : memref<128x128xf32, #tpu.memory_space<vmem>>, vector<128x128xf32>
    tpu.vector_store %arg6[%c0_11, %c0_12], %26 {strides = array<i32>} : memref<128x128xf32, #tpu.memory_space<vmem>>, vector<128x128xf32>,
    return
  }
  func.func @transform_0(%arg0: i32) -> (i32, i32, i32) {
    %c0_i32 = arith.constant 0 : i32
    %c0_i32_0 = arith.constant 0 : i32
    %c0_i32_1 = arith.constant 0 : i32
    return %c0_i32, %arg0, %c0_i32_0 : i32, i32, i32
  }
  func.func @transform_1(%arg0: i32) -> (i32, i32) {
    %c0_i32 = arith.constant 0 : i32
    %c0_i32_0 = arith.constant 0 : i32
    %c0_i32_1 = arith.constant 0 : i32
    return %c0_i32, %c0_i32_0 : i32, i32
  }
  func.func @transform_2(%arg0: i32) -> (i32, i32) {
    %c0_i32 = arith.constant 0 : i32
    %c0_i32_0 = arith.constant 0 : i32
    %c0_i32_1 = arith.constant 0 : i32
    return %c0_i32, %c0_i32_0 : i32, i32
  }
  func.func @transform_3(%arg0: i32) -> (i32, i32) {
    %c0_i32 = arith.constant 0 : i32
    %c0_i32_0 = arith.constant 0 : i32
    %c0_i32_1 = arith.constant 0 : i32
    return %c0_i32, %c0_i32_0 : i32, i32
  }
  func.func @transform_4(%arg0: i32) -> (i32, i32) {
    %c0_i32 = arith.constant 0 : i32
    %c0_i32_0 = arith.constant 0 : i32
    %c0_i32_1 = arith.constant 0 : i32
    return %c0_i32, %c0_i32_0 : i32, i32
  }
  func.func @transform_5(%arg0: i32) -> (i32, i32) {
    %c0_i32 = arith.constant 0 : i32
    %c0_i32_0 = arith.constant 0 : i32
    return %arg0, %c0_i32 : i32, i32
  }
}

module attributes {stable_mosaic.version = 11 : i64} {
  func.func @conv_block_kernel(%arg0: i32, %arg1: memref<4x32x128xbf16, #tpu.memory_space<vmem>>, %arg2: memref<128x128xbf16, #tpu.memory_space<vmem>>, %arg3: memref<1x128xf32, #tpu.memory_space<vmem>>, %arg4: memref<1x128xf32, #tpu.memory_space<vmem>>, %arg5: memref<1x128xf32, #tpu.memory_space<vmem>>, %arg6: memref<32x128xf32, #tpu.memory_space<vmem>>) attributes {dimension_semantics = [#tpu.dimension_semantics<parallel>], iteration_bounds = array<i64: 1>, scalar_prefetch = 0 : i64, scratch_operands = 0 : i64, tpu.core_type = #tpu.core_type<tc>, window_params = [{transform_indices = @transform_0, window_bounds = array<i64: 4, 32, 128>}, {pipeline_mode = #tpu.pipeline_mode<synchronous>, transform_indices = @transform_1, window_bounds = array<i64: 128, 128>}, {pipeline_mode = #tpu.pipeline_mode<synchronous>, transform_indices = @transform_2, window_bounds = array<i64: 1, 128>}, {pipeline_mode = #tpu.pipeline_mode<synchronous>, transform_indices = @transform_3, window_bounds = array<i64: 1, 128>}, {pipeline_mode = #tpu.pipeline_mode<synchronous>, transform_indices = @transform_4, window_bounds = array<i64: 1, 128>}, {transform_indices = @transform_5, window_bounds = array<i64: 32, 128>}]} {
    %c0 = arith.constant 0 : index
    %c0_0 = arith.constant 0 : index
    %c0_1 = arith.constant 0 : index
    %0 = vector.load %arg1[%c0, %c0_0, %c0_1] : memref<4x32x128xbf16, #tpu.memory_space<vmem>>, vector<4x32x128xbf16>
    %1 = vector.shape_cast %0 : vector<4x32x128xbf16> to vector<128x128xbf16>
    %c0_2 = arith.constant 0 : index
    %c0_3 = arith.constant 0 : index
    %2 = vector.load %arg2[%c0_2, %c0_3] : memref<128x128xbf16, #tpu.memory_space<vmem>>, vector<128x128xbf16>
    %cst = arith.constant dense<0.000000e+00> : vector<128x128xf32>
    %3 = tpu.matmul %1, %2, %cst {dimension_numbers = #tpu.dot_dimension_numbers<[1], [0], [0], [1], [0, 0, 1, 1], [], []>} : vector<128x128xbf16>, vector<128x128xbf16>, vector<128x128xf32> -> vector<128x128xf32>
    %c0_4 = arith.constant 0 : index
    %c0_5 = arith.constant 0 : index
    %4 = vector.load %arg3[%c0_4, %c0_5] : memref<1x128xf32, #tpu.memory_space<vmem>>, vector<1x128xf32>
    %5 = vector.broadcast %4 : vector<1x128xf32> to vector<128x128xf32>
    %6 = arith.addf %3, %5 : vector<128x128xf32>
    %cst_6 = arith.constant 0.000000e+00 : f32
    %7 = vector.broadcast %cst_6 : f32 to vector<128x128xf32>
    %8 = arith.maximumf %6, %7 : vector<128x128xf32>
    %c0_7 = arith.constant 0 : index
    %c0_8 = arith.constant 0 : index
    %9 = vector.load %arg4[%c0_7, %c0_8] : memref<1x128xf32, #tpu.memory_space<vmem>>, vector<1x128xf32>
    %10 = vector.broadcast %9 : vector<1x128xf32> to vector<128x128xf32>
    %11 = arith.mulf %8, %10 : vector<128x128xf32>
    %c0_9 = arith.constant 0 : index
    %c0_10 = arith.constant 0 : index
    %12 = vector.load %arg5[%c0_9, %c0_10] : memref<1x128xf32, #tpu.memory_space<vmem>>, vector<1x128xf32>
    %13 = vector.broadcast %12 : vector<1x128xf32> to vector<128x128xf32>
    %14 = arith.addf %11, %13 : vector<128x128xf32>
    %15 = vector.shape_cast %14 : vector<128x128xf32> to vector<4x32x128xf32>
    %16 = vector.extract_strided_slice %15 {offsets = [0, 0, 0], sizes = [1, 32, 128], strides = [1, 1, 1]} : vector<4x32x128xf32> to vector<1x32x128xf32>
    %17 = vector.shape_cast %16 : vector<1x32x128xf32> to vector<32x128xf32>
    %18 = vector.extract_strided_slice %15 {offsets = [1, 0, 0], sizes = [1, 32, 128], strides = [1, 1, 1]} : vector<4x32x128xf32> to vector<1x32x128xf32>
    %19 = vector.shape_cast %18 : vector<1x32x128xf32> to vector<32x128xf32>
    %20 = arith.maximumf %17, %19 : vector<32x128xf32>
    %21 = vector.extract_strided_slice %15 {offsets = [2, 0, 0], sizes = [1, 32, 128], strides = [1, 1, 1]} : vector<4x32x128xf32> to vector<1x32x128xf32>
    %22 = vector.shape_cast %21 : vector<1x32x128xf32> to vector<32x128xf32>
    %23 = vector.extract_strided_slice %15 {offsets = [3, 0, 0], sizes = [1, 32, 128], strides = [1, 1, 1]} : vector<4x32x128xf32> to vector<1x32x128xf32>
    %24 = vector.shape_cast %23 : vector<1x32x128xf32> to vector<32x128xf32>
    %25 = arith.maximumf %22, %24 : vector<32x128xf32>
    %26 = arith.maximumf %20, %25 : vector<32x128xf32>
    %c0_11 = arith.constant 0 : index
    %c0_12 = arith.constant 0 : index
    %27 = vector.load %arg6[%c0_11, %c0_12] : memref<32x128xf32, #tpu.memory_space<vmem>>, vector<32x128xf32>
    tpu.vector_store %arg6[%c0_11, %c0_12], %26 {strides = array<i32>} : memref<32x128xf32, #tpu.memory_space<vmem>>, vector<32x128xf32>,
    return
  }
  func.func @transform_0(%arg0: i32) -> (i32, i32, i32) {
    %c0_i32 = arith.constant 0 : i32
    %c0_i32_0 = arith.constant 0 : i32
    %c0_i32_1 = arith.constant 0 : i32
    return %c0_i32, %arg0, %c0_i32_0 : i32, i32, i32
  }
  func.func @transform_1(%arg0: i32) -> (i32, i32) {
    %c0_i32 = arith.constant 0 : i32
    %c0_i32_0 = arith.constant 0 : i32
    %c0_i32_1 = arith.constant 0 : i32
    return %c0_i32, %c0_i32_0 : i32, i32
  }
  func.func @transform_2(%arg0: i32) -> (i32, i32) {
    %c0_i32 = arith.constant 0 : i32
    %c0_i32_0 = arith.constant 0 : i32
    %c0_i32_1 = arith.constant 0 : i32
    return %c0_i32, %c0_i32_0 : i32, i32
  }
  func.func @transform_3(%arg0: i32) -> (i32, i32) {
    %c0_i32 = arith.constant 0 : i32
    %c0_i32_0 = arith.constant 0 : i32
    %c0_i32_1 = arith.constant 0 : i32
    return %c0_i32, %c0_i32_0 : i32, i32
  }
  func.func @transform_4(%arg0: i32) -> (i32, i32) {
    %c0_i32 = arith.constant 0 : i32
    %c0_i32_0 = arith.constant 0 : i32
    %c0_i32_1 = arith.constant 0 : i32
    return %c0_i32, %c0_i32_0 : i32, i32
  }
  func.func @transform_5(%arg0: i32) -> (i32, i32) {
    %c0_i32 = arith.constant 0 : i32
    %c0_i32_0 = arith.constant 0 : i32
    return %arg0, %c0_i32 : i32, i32
  }
}

module attributes {stable_mosaic.version = 11 : i64} {
  func.func @last_block_heads_kernel(%arg0: memref<4x8x256xbf16, #tpu.memory_space<vmem>>, %arg1: memref<256x128xbf16, #tpu.memory_space<vmem>>, %arg2: memref<1x128xf32, #tpu.memory_space<vmem>>, %arg3: memref<1x128xf32, #tpu.memory_space<vmem>>, %arg4: memref<1x128xf32, #tpu.memory_space<vmem>>, %arg5: memref<128x256xbf16, #tpu.memory_space<vmem>>, %arg6: memref<1x256xf32, #tpu.memory_space<vmem>>, %arg7: memref<256x128xbf16, #tpu.memory_space<vmem>>, %arg8: memref<1x128xf32, #tpu.memory_space<vmem>>, %arg9: memref<2x128xf32, #tpu.memory_space<vmem>>) attributes {dimension_semantics = [], scalar_prefetch = 0 : i64, scratch_operands = 0 : i64, tpu.core_type = #tpu.core_type<tc>} {
    %c0 = arith.constant 0 : index
    %c0_0 = arith.constant 0 : index
    %c0_1 = arith.constant 0 : index
    %0 = vector.load %arg0[%c0, %c0_0, %c0_1] : memref<4x8x256xbf16, #tpu.memory_space<vmem>>, vector<4x8x256xbf16>
    %1 = vector.shape_cast %0 : vector<4x8x256xbf16> to vector<32x256xbf16>
    %c0_2 = arith.constant 0 : index
    %c0_3 = arith.constant 0 : index
    %2 = vector.load %arg1[%c0_2, %c0_3] : memref<256x128xbf16, #tpu.memory_space<vmem>>, vector<256x128xbf16>
    %cst = arith.constant dense<0.000000e+00> : vector<32x128xf32>
    %3 = tpu.matmul %1, %2, %cst {dimension_numbers = #tpu.dot_dimension_numbers<[1], [0], [0], [1], [0, 0, 1, 1], [], []>} : vector<32x256xbf16>, vector<256x128xbf16>, vector<32x128xf32> -> vector<32x128xf32>
    %c0_4 = arith.constant 0 : index
    %c0_5 = arith.constant 0 : index
    %4 = vector.load %arg2[%c0_4, %c0_5] : memref<1x128xf32, #tpu.memory_space<vmem>>, vector<1x128xf32>
    %5 = vector.broadcast %4 : vector<1x128xf32> to vector<32x128xf32>
    %6 = arith.addf %3, %5 : vector<32x128xf32>
    %cst_6 = arith.constant 0.000000e+00 : f32
    %7 = vector.broadcast %cst_6 : f32 to vector<32x128xf32>
    %8 = arith.maximumf %6, %7 : vector<32x128xf32>
    %c0_7 = arith.constant 0 : index
    %c0_8 = arith.constant 0 : index
    %9 = vector.load %arg3[%c0_7, %c0_8] : memref<1x128xf32, #tpu.memory_space<vmem>>, vector<1x128xf32>
    %10 = vector.broadcast %9 : vector<1x128xf32> to vector<32x128xf32>
    %11 = arith.mulf %8, %10 : vector<32x128xf32>
    %c0_9 = arith.constant 0 : index
    %c0_10 = arith.constant 0 : index
    %12 = vector.load %arg4[%c0_9, %c0_10] : memref<1x128xf32, #tpu.memory_space<vmem>>, vector<1x128xf32>
    %13 = vector.broadcast %12 : vector<1x128xf32> to vector<32x128xf32>
    %14 = arith.addf %11, %13 : vector<32x128xf32>
    %15 = vector.shape_cast %14 : vector<32x128xf32> to vector<4x8x128xf32>
    %16 = vector.extract_strided_slice %15 {offsets = [0, 0, 0], sizes = [1, 8, 128], strides = [1, 1, 1]} : vector<4x8x128xf32> to vector<1x8x128xf32>
    %17 = vector.shape_cast %16 : vector<1x8x128xf32> to vector<8x128xf32>
    %18 = vector.extract_strided_slice %15 {offsets = [1, 0, 0], sizes = [1, 8, 128], strides = [1, 1, 1]} : vector<4x8x128xf32> to vector<1x8x128xf32>
    %19 = vector.shape_cast %18 : vector<1x8x128xf32> to vector<8x128xf32>
    %20 = arith.maximumf %17, %19 : vector<8x128xf32>
    %21 = vector.extract_strided_slice %15 {offsets = [2, 0, 0], sizes = [1, 8, 128], strides = [1, 1, 1]} : vector<4x8x128xf32> to vector<1x8x128xf32>
    %22 = vector.shape_cast %21 : vector<1x8x128xf32> to vector<8x128xf32>
    %23 = vector.extract_strided_slice %15 {offsets = [3, 0, 0], sizes = [1, 8, 128], strides = [1, 1, 1]} : vector<4x8x128xf32> to vector<1x8x128xf32>
    %24 = vector.shape_cast %23 : vector<1x8x128xf32> to vector<8x128xf32>
    %25 = arith.maximumf %22, %24 : vector<8x128xf32>
    %26 = arith.maximumf %20, %25 : vector<8x128xf32>
    %27 = vector.shape_cast %26 : vector<8x128xf32> to vector<2x4x128xf32>
    %cst_11 = arith.constant dense<0.000000e+00> : vector<2x128xf32>
    %28 = vector.multi_reduction <add>, %27, %cst_11 [1] : vector<2x4x128xf32> to vector<2x128xf32>
    %cst_12 = arith.constant 4.000000e+00 : f32
    %29 = vector.broadcast %cst_12 : f32 to vector<2x128xf32>
    %30 = arith.divf %28, %29 : vector<2x128xf32>
    %31 = arith.truncf %30 : vector<2x128xf32> to vector<2x128xbf16>
    %c0_13 = arith.constant 0 : index
    %c0_14 = arith.constant 0 : index
    %32 = vector.load %arg5[%c0_13, %c0_14] : memref<128x256xbf16, #tpu.memory_space<vmem>>, vector<128x256xbf16>
    %cst_15 = arith.constant dense<0.000000e+00> : vector<2x256xf32>
    %33 = tpu.matmul %31, %32, %cst_15 {dimension_numbers = #tpu.dot_dimension_numbers<[1], [0], [0], [1], [0, 0, 1, 1], [], []>} : vector<2x128xbf16>, vector<128x256xbf16>, vector<2x256xf32> -> vector<2x256xf32>
    %c0_16 = arith.constant 0 : index
    %c0_17 = arith.constant 0 : index
    %34 = vector.load %arg6[%c0_16, %c0_17] : memref<1x256xf32, #tpu.memory_space<vmem>>, vector<1x256xf32>
    %35 = vector.broadcast %34 : vector<1x256xf32> to vector<2x256xf32>
    %36 = arith.addf %33, %35 : vector<2x256xf32>
    %cst_18 = arith.constant 0.000000e+00 : f32
    %37 = vector.broadcast %cst_18 : f32 to vector<2x256xf32>
    %38 = arith.maximumf %36, %37 : vector<2x256xf32>
    %39 = arith.truncf %38 : vector<2x256xf32> to vector<2x256xbf16>
    %c0_19 = arith.constant 0 : index
    %c0_20 = arith.constant 0 : index
    %40 = vector.load %arg7[%c0_19, %c0_20] : memref<256x128xbf16, #tpu.memory_space<vmem>>, vector<256x128xbf16>
    %cst_21 = arith.constant dense<0.000000e+00> : vector<2x128xf32>
    %41 = tpu.matmul %39, %40, %cst_21 {dimension_numbers = #tpu.dot_dimension_numbers<[1], [0], [0], [1], [0, 0, 1, 1], [], []>} : vector<2x256xbf16>, vector<256x128xbf16>, vector<2x128xf32> -> vector<2x128xf32>
    %c0_22 = arith.constant 0 : index
    %c0_23 = arith.constant 0 : index
    %42 = vector.load %arg8[%c0_22, %c0_23] : memref<1x128xf32, #tpu.memory_space<vmem>>, vector<1x128xf32>
    %43 = vector.broadcast %42 : vector<1x128xf32> to vector<2x128xf32>
    %44 = arith.addf %41, %43 : vector<2x128xf32>
    %c0_24 = arith.constant 0 : index
    %c0_25 = arith.constant 0 : index
    %45 = vector.load %arg9[%c0_24, %c0_25] : memref<2x128xf32, #tpu.memory_space<vmem>>, vector<2x128xf32>
    tpu.vector_store %arg9[%c0_24, %c0_25], %44 {strides = array<i32>} : memref<2x128xf32, #tpu.memory_space<vmem>>, vector<2x128xf32>,
    return
  }
}

</mosaic_0001>

<bundles_post_ra>
// kernel: mhcnn_forward.3
= control target key start
LH: loop header
LB: loop body
LE: loop exit
PB: predicated region body
PF: predicated region fallthrough
CT: control target
= control target key end

     0   :  { %s1631_s1 = inlined_call_operand.vmem [shape: bf16[128,128], index: 1, kind: input, shape index: {}]   ;;  %s1632_s0 = inlined_call_operand.vmem [shape: bf16[4,128,128], index: 0, kind: input, shape index: {}]   ;;  %s1633_s2 = inlined_call_operand.vmem [shape: f32[1,128], index: 2, kind: input, shape index: {}]   ;;  %s1634_s3 = inlined_call_operand.vmem [shape: f32[1,128], index: 3, kind: input, shape index: {}]   ;;  %s1635_s4 = inlined_call_operand.vmem [shape: f32[1,128], index: 4, kind: input, shape index: {}]   ;;  %s1636_s5 = inlined_call_operand.vmem [shape: f32[128,128], index: 5, kind: output, shape index: {}]  }
   0x1   :  { %v1090_v0 = vld [vmem:[%s1631_s1] sm:$0xff]   ;;  %v1091_v1 = vld [vmem:[%s1631_s1 + $0x8] sm:$0xff]   ;;  %v1092_v2 = vld [vmem:[%s1631_s1 + $0x10] sm:$0xff]  }
   0x2   :  { %994 = vmatprep.subr.bf16.mxu0 %v1090_v0  ;;  %1074 = vmatprep.subr.bf16.mxu1 %v1090_v0  ;;  %v1093_v3 = vld [vmem:[%s1631_s1 + $0x18] sm:$0xff]   ;;  %v1098_v4 = vld [vmem:[%s1632_s0] sm:$0xff]   ;;  %v1095_v7 = vld [vmem:[%s1631_s1 + $0x28] sm:$0xff]  }
   0x3   :  { %995 = vmatpush3.bf16.msra.mxu0 %v1090_v0  ;;  %1082 = vmatpush3.bf16.msra.mxu1 %v1090_v0  ;;  %v1099_v5 = vld [vmem:[%s1632_s0 + $0x80] sm:$0xff]   ;;  %v1096_v8 = vld [vmem:[%s1631_s1 + $0x30] sm:$0xff]   ;;  %v1097_v9 = vld [vmem:[%s1631_s1 + $0x38] sm:$0xff]  }
   0x4   :  { %996 = vmatprep.subr.bf16.mxu0 %v1091_v1  ;;  %1075 = vmatprep.subr.bf16.mxu1 %v1091_v1  ;;  %v1094_v6 = vld [vmem:[%s1631_s1 + $0x20] sm:$0xff]   ;;  %v1100_v10 = vld [vmem:[%s1632_s0 + $0x8] sm:$0xff]   ;;  %v1102_v12 = vld [vmem:[%s1632_s0 + $0x10] sm:$0xff]  }
   0x5   :  { %1010 = vmatprep.mubr.bf16.mxu0 %v1098_v4  ;;  %1042 = vmatprep.mubr.bf16.mxu1 %v1099_v5  ;;  %v1101_v11 = vld [vmem:[%s1632_s0 + $0x88] sm:$0xff]   ;;  %v1103_v13 = vld [vmem:[%s1632_s0 + $0x90] sm:$0xff]   ;;  %v1104_v14 = vld [vmem:[%s1632_s0 + $0x18] sm:$0xff]  }
   0x6   :  { %v1105_v15 = vld [vmem:[%s1632_s0 + $0x98] sm:$0xff]   ;;  %v1106_v16 = vld [vmem:[%s1632_s0 + $0x20] sm:$0xff]   ;;  %v1108_v18 = vld [vmem:[%s1632_s0 + $0x28] sm:$0xff]  }
   0x7   :  { %997 = vmatpush3.bf16.msra.mxu0 %v1091_v1  ;;  %1083 = vmatpush3.bf16.msra.mxu1 %v1091_v1  ;;  %v1107_v17 = vld [vmem:[%s1632_s0 + $0xa0] sm:$0xff]   ;;  %v1109_v19 = vld [vmem:[%s1632_s0 + $0xa8] sm:$0xff]   ;;  %v1110_v20 = vld [vmem:[%s1632_s0 + $0x30] sm:$0xff]  }
   0x8   :  { %998 = vmatprep.subr.bf16.mxu0 %v1092_v2  ;;  %1076 = vmatprep.subr.bf16.mxu1 %v1092_v2  ;;  %v1111_v21 = vld [vmem:[%s1632_s0 + $0xb0] sm:$0xff]   ;;  %v1112_v22 = vld [vmem:[%s1632_s0 + $0x38] sm:$0xff]   ;;  %v1114_v24 = vld [vmem:[%s1632_s0 + $0x40] sm:$0xff]  }
   0x9   :  { %v1113_v23 = vld [vmem:[%s1632_s0 + $0xb8] sm:$0xff]   ;;  %v1115_v25 = vld [vmem:[%s1632_s0 + $0xc0] sm:$0xff]   ;;  %v1116_v26 = vld [vmem:[%s1632_s0 + $0x48] sm:$0xff]  }
   0xa   :  { %v1117_v27 = vld [vmem:[%s1632_s0 + $0xc8] sm:$0xff]   ;;  %v1118_v28 = vld [vmem:[%s1632_s0 + $0x50] sm:$0xff]   ;;  %v1120_v30 = vld [vmem:[%s1632_s0 + $0x58] sm:$0xff]  }
   0xb   :  { %999 = vmatpush3.bf16.msra.mxu0 %v1092_v2  ;;  %1084 = vmatpush3.bf16.msra.mxu1 %v1092_v2  ;;  %v1119_v29 = vld [vmem:[%s1632_s0 + $0xd0] sm:$0xff]   ;;  %v1121_v31 = vld [vmem:[%s1632_s0 + $0xd8] sm:$0xff]   ;;  %v1122_v32 = vld [vmem:[%s1632_s0 + $0x60] sm:$0xff]  }
   0xc   :  { %1000 = vmatprep.subr.bf16.mxu0 %v1093_v3  ;;  %1077 = vmatprep.subr.bf16.mxu1 %v1093_v3  ;;  %v1123_v33 = vld [vmem:[%s1632_s0 + $0xe0] sm:$0xff]   ;;  %v1124_v34 = vld [vmem:[%s1632_s0 + $0x68] sm:$0xff]   ;;  %v1126_v36 = vld [vmem:[%s1632_s0 + $0x70] sm:$0xff]  }
   0xd   :  { %v1125_v35 = vld [vmem:[%s1632_s0 + $0xe8] sm:$0xff]   ;;  %v1127_v37 = vld [vmem:[%s1632_s0 + $0xf0] sm:$0xff]   ;;  %v1128_v38 = vld [vmem:[%s1632_s0 + $0x78] sm:$0xff]  }
   0xe   :  { %v1129_v39 = vld [vmem:[%s1632_s0 + $0xf8] sm:$0xff]   ;;  %v1283_v40 = vld [vmem:[%s1633_s2] ss:$0 sm:$0xff] }
   0xf   :  { %1001 = vmatpush3.bf16.msra.mxu0 %v1093_v3  ;;  %1085 = vmatpush3.bf16.msra.mxu1 %v1093_v3  ;;  %v1290_v47 = vld [vmem:[%s1634_s3] ss:$0 sm:$0xff] }
  0x10   :  { %1002 = vmatprep.subr.bf16.mxu0 %v1094_v6  ;;  %1078 = vmatprep.subr.bf16.mxu1 %v1094_v6  ;;  %v1302_v63 = vld [vmem:[%s1635_s4] ss:$0 sm:$0xff] }
  0x13   :  { %1003 = vmatpush3.bf16.msra.mxu0 %v1094_v6  ;;  %1086 = vmatpush3.bf16.msra.mxu1 %v1094_v6 }
  0x14   :  { %1004 = vmatprep.subr.bf16.mxu0 %v1095_v7  ;;  %1079 = vmatprep.subr.bf16.mxu1 %v1095_v7 }
  0x17   :  { %1005 = vmatpush3.bf16.msra.mxu0 %v1095_v7  ;;  %1087 = vmatpush3.bf16.msra.mxu1 %v1095_v7 }
  0x18   :  { %1006 = vmatprep.subr.bf16.mxu0 %v1096_v8  ;;  %1080 = vmatprep.subr.bf16.mxu1 %v1096_v8 }
  0x1b   :  { %1007 = vmatpush3.bf16.msra.mxu0 %v1096_v8  ;;  %1088 = vmatpush3.bf16.msra.mxu1 %v1096_v8 }
  0x1c   :  { %1008 = vmatprep.subr.bf16.mxu0 %v1097_v9  ;;  %1081 = vmatprep.subr.bf16.mxu1 %v1097_v9 }
  0x1f   :  { %1009 = vmatpush3.bf16.msra.mxu0 %v1097_v9  ;;  %1089 = vmatpush3.bf16.msra.mxu1 %v1097_v9 }
  0x22   :  { %1011 = vmatmul.mubr.bf16.vlgmr.msra.gmra.mrb[0].mxu0 %v1100_v10  ;;  %1043 = vmatmul.mubr.bf16.vlgmr.msra.gmra.mrb[0].mxu1 %v1101_v11 }
  0x23   :  { %1014 = vmatprep.mubr.bf16.mxu0 %v1102_v12  ;;  %1046 = vmatprep.mubr.bf16.mxu1 %v1103_v13 }
  0x2a   :  { %1015 = vmatmul.mubr.bf16.gmra.mrb[4].mxu0 %v1104_v14  ;;  %1047 = vmatmul.mubr.bf16.gmra.mrb[4].mxu1 %v1105_v15 }
  0x2b   :  { %1018 = vmatprep.mubr.bf16.mxu0 %v1106_v16  ;;  %1050 = vmatprep.mubr.bf16.mxu1 %v1107_v17 }
  0x32   :  { %1019 = vmatmul.mubr.bf16.gmra.mrb[8].mxu0 %v1108_v18  ;;  %1051 = vmatmul.mubr.bf16.gmra.mrb[8].mxu1 %v1109_v19 }
  0x33   :  { %1022 = vmatprep.mubr.bf16.mxu0 %v1110_v20  ;;  %1054 = vmatprep.mubr.bf16.mxu1 %v1111_v21 }
  0x3a   :  { %1023 = vmatmul.mubr.bf16.gmra.mrb[12].mxu0 %v1112_v22  ;;  %1055 = vmatmul.mubr.bf16.gmra.mrb[12].mxu1 %v1113_v23 }
  0x3b   :  { %1026 = vmatprep.mubr.bf16.mxu0 %v1114_v24  ;;  %1058 = vmatprep.mubr.bf16.mxu1 %v1115_v25 }
  0x42   :  { %1027 = vmatmul.mubr.bf16.gmra.mrb[16].mxu0 %v1116_v26  ;;  %1059 = vmatmul.mubr.bf16.gmra.mrb[16].mxu1 %v1117_v27 }
  0x43   :  { %1030 = vmatprep.mubr.bf16.mxu0 %v1118_v28  ;;  %1062 = vmatprep.mubr.bf16.mxu1 %v1119_v29 }
  0x4a   :  { %1031 = vmatmul.mubr.bf16.gmra.mrb[20].mxu0 %v1120_v30  ;;  %1063 = vmatmul.mubr.bf16.gmra.mrb[20].mxu1 %v1121_v31 }
  0x4b   :  { %1034 = vmatprep.mubr.bf16.mxu0 %v1122_v32  ;;  %1066 = vmatprep.mubr.bf16.mxu1 %v1123_v33 }
  0x52   :  { %1035 = vmatmul.mubr.bf16.gmra.mrb[24].mxu0 %v1124_v34  ;;  %1067 = vmatmul.mubr.bf16.gmra.mrb[24].mxu1 %v1125_v35 }
  0x53   :  { %1038 = vmatprep.mubr.bf16.mxu0 %v1126_v36  ;;  %1070 = vmatprep.mubr.bf16.mxu1 %v1127_v37 }
  0x5a   :  { %1039 = vmatmul.mubr.bf16.gmra.mrb[28].mxu0 %v1128_v38  ;;  %1071 = vmatmul.mubr.bf16.gmra.mrb[28].mxu1 %v1129_v39 }
  0xf5   :  { %v1012_v41 = vpop.f32.mrb[0].mxu0  ;;  %v1044_v42 = vpop.f32.mrb[0].mxu1 }
  0xf6   :  { %v391_v43 = vadd.f32 %v1012_v41, %v1283_v40  ;;  %v519_v44 = vadd.f32 %v1044_v42, %v1283_v40  ;;  %v382_v45 = vpop.f32.mrb[1].mxu0  ;;  %v510_v46 = vpop.f32.mrb[1].mxu1 }
  0xf7   :  { %v383_v48 = vadd.f32 %v1283_v40, %v382_v45  ;;  %v511_v49 = vadd.f32 %v1283_v40, %v510_v46  ;;  %v1013_v50 = vpop.f32.mrb[2].mxu0  ;;  %v1045_v51 = vpop.f32.mrb[2].mxu1 }
  0xf8   :  { %v639_v52 = vmax.f32 %v391_v43, 0.0  ;;  %v671_v53 = vmax.f32 %v519_v44, 0.0  ;;  %v394_v54 = vadd.f32 %v1013_v50, %v1283_v40  ;;  %v522_v55 = vadd.f32 %v1045_v51, %v1283_v40  ;;  %v385_v56 = vpop.f32.mrb[3].mxu0  ;;  %v513_v57 = vpop.f32.mrb[3].mxu1 }
  0xf9   :  { %v637_v58 = vmax.f32 %v383_v48, 0.0  ;;  %v669_v59 = vmax.f32 %v511_v49, 0.0  ;;  %v386_v60 = vadd.f32 %v1283_v40, %v385_v56  ;;  %v514_v61 = vadd.f32 %v1283_v40, %v513_v57 }
  0xfa   :  { %v710_v62 = vmul.f32 %v1290_v47, %v639_v52  ;;  %v742_v0 = vmul.f32 %v1290_v47, %v671_v53  ;;  %v640_v1 = vmax.f32 %v394_v54, 0.0  ;;  %v672_v2 = vmax.f32 %v522_v55, 0.0 }
  0xfb   :  { %v708_v3 = vmul.f32 %v1290_v47, %v637_v58  ;;  %v740_v4 = vmul.f32 %v1290_v47, %v669_v59  ;;  %v638_v5 = vmax.f32 %v386_v60, 0.0  ;;  %v670_v6 = vmax.f32 %v514_v61, 0.0 }
  0xfc   :  { %v711_v7 = vmul.f32 %v1290_v47, %v640_v1  ;;  %v1309_v8 = vadd.f32 %v1302_v63, %v710_v62  ;;  %v1312_v9 = vadd.f32 %v1302_v63, %v742_v0  ;;  %v743_v11 = vmul.f32 %v1290_v47, %v672_v2 }
  0xfd   :  { %v1315_v10 = vadd.f32 %v1302_v63, %v708_v3  ;;  %v1016_v12 = vpop.f32.mrb[4].mxu0  ;;  %v1048_v13 = vpop.f32.mrb[4].mxu1  ;;  %v1319_v14 = vadd.f32 %v1302_v63, %v740_v4  ;;  %v709_v15 = vmul.f32 %v1290_v47, %v638_v5  ;;  %v741_v21 = vmul.f32 %v1290_v47, %v670_v6 }
  0xfe   :  { %v407_v16 = vadd.f32 %v1016_v12, %v1283_v40  ;;  %v535_v17 = vadd.f32 %v1048_v13, %v1283_v40  ;;  %v398_v18 = vpop.f32.mrb[5].mxu0  ;;  %v526_v19 = vpop.f32.mrb[5].mxu1  ;;  %v1325_v20 = vadd.f32 %v1302_v63, %v711_v7  ;;  %v1339_v45 = vadd.f32 %v1302_v63, %v743_v11 }
  0xff   :  { %v399_v22 = vadd.f32 %v1283_v40, %v398_v18  ;;  %v527_v23 = vadd.f32 %v1283_v40, %v526_v19  ;;  %v1017_v24 = vpop.f32.mrb[6].mxu0  ;;  %v1049_v25 = vpop.f32.mrb[6].mxu1  ;;  %v1342_v46 = vadd.f32 %v1302_v63, %v709_v15  ;;  %v1345_v48 = vadd.f32 %v1302_v63, %v741_v21 }
 0x100   :  { %v643_v26 = vmax.f32 %v407_v16, 0.0  ;;  %v675_v27 = vmax.f32 %v535_v17, 0.0  ;;  %v410_v28 = vadd.f32 %v1017_v24, %v1283_v40  ;;  %v538_v29 = vadd.f32 %v1049_v25, %v1283_v40  ;;  %v401_v30 = vpop.f32.mrb[7].mxu0  ;;  %v529_v31 = vpop.f32.mrb[7].mxu1 }
 0x101   :  { %v641_v32 = vmax.f32 %v399_v22, 0.0  ;;  %v673_v33 = vmax.f32 %v527_v23, 0.0  ;;  %v402_v34 = vadd.f32 %v1283_v40, %v401_v30  ;;  %v530_v35 = vadd.f32 %v1283_v40, %v529_v31 }
 0x102   :  { %v714_v36 = vmul.f32 %v1290_v47, %v643_v26  ;;  %v746_v37 = vmul.f32 %v1290_v47, %v675_v27  ;;  %v644_v38 = vmax.f32 %v410_v28, 0.0  ;;  %v676_v39 = vmax.f32 %v538_v29, 0.0 }
 0x103   :  { %v712_v41 = vmul.f32 %v1290_v47, %v641_v32  ;;  %v744_v42 = vmul.f32 %v1290_v47, %v673_v33  ;;  %v642_v43 = vmax.f32 %v402_v34, 0.0  ;;  %v674_v44 = vmax.f32 %v530_v35, 0.0 }
 0x104   :  { %v715_v49 = vmul.f32 %v1290_v47, %v644_v38  ;;  %v1349_v50 = vadd.f32 %v1302_v63, %v714_v36  ;;  %v1352_v51 = vadd.f32 %v1302_v63, %v746_v37  ;;  %v747_v53 = vmul.f32 %v1290_v47, %v676_v39 }
 0x105   :  { %v1355_v52 = vadd.f32 %v1302_v63, %v712_v41  ;;  %v1020_v54 = vpop.f32.mrb[8].mxu0  ;;  %v1052_v55 = vpop.f32.mrb[8].mxu1  ;;  %v1359_v56 = vadd.f32 %v1302_v63, %v744_v42  ;;  %v713_v57 = vmul.f32 %v1290_v47, %v642_v43  ;;  %v745_v0 = vmul.f32 %v1290_v47, %v674_v44 }
 0x106   :  { %v423_v58 = vadd.f32 %v1020_v54, %v1283_v40  ;;  %v551_v59 = vadd.f32 %v1052_v55, %v1283_v40  ;;  %v414_v60 = vpop.f32.mrb[9].mxu0  ;;  %v542_v61 = vpop.f32.mrb[9].mxu1  ;;  %v1365_v62 = vadd.f32 %v1302_v63, %v715_v49  ;;  %v1379_v28 = vadd.f32 %v1302_v63, %v747_v53 }
 0x107   :  { %v415_v1 = vadd.f32 %v1283_v40, %v414_v60  ;;  %v543_v2 = vadd.f32 %v1283_v40, %v542_v61  ;;  %v1021_v3 = vpop.f32.mrb[10].mxu0  ;;  %v1053_v4 = vpop.f32.mrb[10].mxu1  ;;  %v1382_v29 = vadd.f32 %v1302_v63, %v713_v57  ;;  %v1385_v30 = vadd.f32 %v1302_v63, %v745_v0 }
 0x108   :  { %v647_v5 = vmax.f32 %v423_v58, 0.0  ;;  %v679_v6 = vmax.f32 %v551_v59, 0.0  ;;  %v426_v7 = vadd.f32 %v1021_v3, %v1283_v40  ;;  %v554_v11 = vadd.f32 %v1053_v4, %v1283_v40  ;;  %v417_v12 = vpop.f32.mrb[11].mxu0  ;;  %v545_v13 = vpop.f32.mrb[11].mxu1 }
 0x109   :  { %v645_v15 = vmax.f32 %v415_v1, 0.0  ;;  %v677_v16 = vmax.f32 %v543_v2, 0.0  ;;  %v418_v17 = vadd.f32 %v1283_v40, %v417_v12  ;;  %v546_v18 = vadd.f32 %v1283_v40, %v545_v13 }
 0x10a   :  { %v718_v19 = vmul.f32 %v1290_v47, %v647_v5  ;;  %v750_v21 = vmul.f32 %v1290_v47, %v679_v6  ;;  %v648_v22 = vmax.f32 %v426_v7, 0.0  ;;  %v680_v23 = vmax.f32 %v554_v11, 0.0 }
 0x10b   :  { %v716_v24 = vmul.f32 %v1290_v47, %v645_v15  ;;  %v748_v25 = vmul.f32 %v1290_v47, %v677_v16  ;;  %v646_v26 = vmax.f32 %v418_v17, 0.0  ;;  %v678_v27 = vmax.f32 %v546_v18, 0.0 }
 0x10c   :  { %v719_v31 = vmul.f32 %v1290_v47, %v648_v22  ;;  %v1389_v32 = vadd.f32 %v1302_v63, %v718_v19  ;;  %v1392_v33 = vadd.f32 %v1302_v63, %v750_v21  ;;  %v751_v35 = vmul.f32 %v1290_v47, %v680_v23 }
 0x10d   :  { %v1395_v34 = vadd.f32 %v1302_v63, %v716_v24  ;;  %v1024_v36 = vpop.f32.mrb[12].mxu0  ;;  %v1056_v37 = vpop.f32.mrb[12].mxu1  ;;  %v1399_v38 = vadd.f32 %v1302_v63, %v748_v25  ;;  %v717_v39 = vmul.f32 %v1290_v47, %v646_v26  ;;  %v749_v53 = vmul.f32 %v1290_v47, %v678_v27 }
 0x10e   :  { %v439_v41 = vadd.f32 %v1024_v36, %v1283_v40  ;;  %v567_v42 = vadd.f32 %v1056_v37, %v1283_v40  ;;  %v430_v43 = vpop.f32.mrb[13].mxu0  ;;  %v558_v44 = vpop.f32.mrb[13].mxu1  ;;  %v1405_v49 = vadd.f32 %v1302_v63, %v719_v31  ;;  %v1419_v19 = vadd.f32 %v1302_v63, %v751_v35 }
 0x10f   :  { %v431_v54 = vadd.f32 %v1283_v40, %v430_v43  ;;  %v559_v55 = vadd.f32 %v1283_v40, %v558_v44  ;;  %v1025_v57 = vpop.f32.mrb[14].mxu0  ;;  %v1057_v58 = vpop.f32.mrb[14].mxu1  ;;  %v1422_v21 = vadd.f32 %v1302_v63, %v717_v39  ;;  %v1425_v22 = vadd.f32 %v1302_v63, %v749_v53 }
 0x110   :  { %v651_v59 = vmax.f32 %v439_v41, 0.0  ;;  %v683_v60 = vmax.f32 %v567_v42, 0.0  ;;  %v442_v61 = vadd.f32 %v1025_v57, %v1283_v40  ;;  %v570_v0 = vadd.f32 %v1057_v58, %v1283_v40  ;;  %v433_v1 = vpop.f32.mrb[15].mxu0  ;;  %v561_v2 = vpop.f32.mrb[15].mxu1 }
 0x111   :  { %v649_v3 = vmax.f32 %v431_v54, 0.0  ;;  %v681_v4 = vmax.f32 %v559_v55, 0.0  ;;  %v434_v5 = vadd.f32 %v1283_v40, %v433_v1  ;;  %v562_v6 = vadd.f32 %v1283_v40, %v561_v2 }
 0x112   :  { %v722_v7 = vmul.f32 %v1290_v47, %v651_v59  ;;  %v754_v11 = vmul.f32 %v1290_v47, %v683_v60  ;;  %v652_v12 = vmax.f32 %v442_v61, 0.0  ;;  %v684_v13 = vmax.f32 %v570_v0, 0.0 }
 0x113   :  { %v720_v15 = vmul.f32 %v1290_v47, %v649_v3  ;;  %v752_v16 = vmul.f32 %v1290_v47, %v681_v4  ;;  %v650_v17 = vmax.f32 %v434_v5, 0.0  ;;  %v682_v18 = vmax.f32 %v562_v6, 0.0 }
 0x114   :  { %v723_v23 = vmul.f32 %v1290_v47, %v652_v12  ;;  %v1429_v24 = vadd.f32 %v1302_v63, %v722_v7  ;;  %v1432_v25 = vadd.f32 %v1302_v63, %v754_v11  ;;  %v1438_v27 = vmul.f32 %v1290_v47, %v684_v13 }
 0x115   :  { %v1435_v26 = vadd.f32 %v1302_v63, %v720_v15  ;;  %v1028_v31 = vpop.f32.mrb[16].mxu0  ;;  %v1060_v35 = vpop.f32.mrb[16].mxu1  ;;  %v1441_v36 = vadd.f32 %v1302_v63, %v752_v16  ;;  %v1444_v37 = vmul.f32 %v1290_v47, %v650_v17  ;;  %v1452_v53 = vmul.f32 %v1290_v47, %v682_v18 }
 0x116   :  { %v455_v39 = vadd.f32 %v1028_v31, %v1283_v40  ;;  %v583_v41 = vadd.f32 %v1060_v35, %v1283_v40  ;;  %v446_v42 = vpop.f32.mrb[17].mxu0  ;;  %v574_v43 = vpop.f32.mrb[17].mxu1  ;;  %v1449_v44 = vadd.f32 %v1302_v63, %v723_v23 }
 0x117   :  { %v447_v54 = vadd.f32 %v1283_v40, %v446_v42  ;;  %v575_v55 = vadd.f32 %v1283_v40, %v574_v43  ;;  %v1029_v57 = vpop.f32.mrb[18].mxu0  ;;  %v1061_v58 = vpop.f32.mrb[18].mxu1 }
 0x118   :  { %v655_v59 = vmax.f32 %v455_v39, 0.0  ;;  %v687_v60 = vmax.f32 %v583_v41, 0.0  ;;  %v458_v61 = vadd.f32 %v1029_v57, %v1283_v40  ;;  %v586_v0 = vadd.f32 %v1061_v58, %v1283_v40  ;;  %v449_v1 = vpop.f32.mrb[19].mxu0  ;;  %v577_v2 = vpop.f32.mrb[19].mxu1 }
 0x119   :  { %v653_v3 = vmax.f32 %v447_v54, 0.0  ;;  %v685_v4 = vmax.f32 %v575_v55, 0.0  ;;  %v450_v5 = vadd.f32 %v1283_v40, %v449_v1  ;;  %v578_v6 = vadd.f32 %v1283_v40, %v577_v2 }
 0x11a   :  { %v726_v7 = vmul.f32 %v1290_v47, %v655_v59  ;;  %v758_v11 = vmul.f32 %v1290_v47, %v687_v60  ;;  %v656_v12 = vmax.f32 %v458_v61, 0.0  ;;  %v688_v13 = vmax.f32 %v586_v0, 0.0 }
 0x11b   :  { %v724_v15 = vmul.f32 %v1290_v47, %v653_v3  ;;  %v756_v16 = vmul.f32 %v1290_v47, %v685_v4  ;;  %v654_v17 = vmax.f32 %v450_v5, 0.0  ;;  %v686_v18 = vmax.f32 %v578_v6, 0.0 }
 0x11c   :  { %v797_v23 = vadd.f32 %v1302_v63, %v726_v7  ;;  %v829_v31 = vadd.f32 %v1302_v63, %v758_v11  ;;  %v727_v35 = vmul.f32 %v1290_v47, %v656_v12  ;;  %v759_v39 = vmul.f32 %v1290_v47, %v688_v13 }
 0x11d   :  { %v795_v41 = vadd.f32 %v1302_v63, %v724_v15  ;;  %v827_v42 = vadd.f32 %v1302_v63, %v756_v16  ;;  %v725_v43 = vmul.f32 %v1290_v47, %v654_v17  ;;  %v757_v54 = vmul.f32 %v1290_v47, %v686_v18  ;;  %v1032_v55 = vpop.f32.mrb[20].mxu0  ;;  %v1064_v57 = vpop.f32.mrb[20].mxu1 }
 0x11e   :  { %v845_v58 = vmax.f32 %v1309_v8, %v797_v23  ;;  %v861_v59 = vmax.f32 %v1312_v9, %v829_v31  ;;  %v798_v60 = vadd.f32 %v1302_v63, %v727_v35  ;;  %v830_v61 = vadd.f32 %v1302_v63, %v759_v39  ;;  %v462_v0 = vpop.f32.mrb[21].mxu0  ;;  %v590_v1 = vpop.f32.mrb[21].mxu1 }
 0x11f   :  { %v843_v2 = vmax.f32 %v1315_v10, %v795_v41  ;;  %v859_v3 = vmax.f32 %v1319_v14, %v827_v42  ;;  %v796_v4 = vadd.f32 %v1302_v63, %v725_v43  ;;  %v828_v5 = vadd.f32 %v1302_v63, %v757_v54  ;;  %v1033_v6 = vpop.f32.mrb[22].mxu0  ;;  %v1065_v7 = vpop.f32.mrb[22].mxu1 }
 0x120   :  { %v877_v11 = vmax.f32 %v845_v58, %v861_v59  ;;  %v846_v8 = vmax.f32 %v1325_v20, %v798_v60  ;;  %v862_v9 = vmax.f32 %v1339_v45, %v830_v61  ;;  %v471_v12 = vadd.f32 %v1032_v55, %v1283_v40  ;;  %v465_v13 = vpop.f32.mrb[23].mxu0  ;;  %v593_v15 = vpop.f32.mrb[23].mxu1 }
 0x121   :  { %v875_v16 = vmax.f32 %v843_v2, %v859_v3  ;;  %v844_v10 = vmax.f32 %v1342_v46, %v796_v4  ;;  %v860_v14 = vmax.f32 %v1345_v48, %v828_v5  ;;  %v599_v17 = vadd.f32 %v1064_v57, %v1283_v40 }
 0x122   :  { %893 = vst [vmem:[%s1636_s5 + $0x10] sm:$0xff] %v877_v11  ;;  %v878_v18 = vmax.f32 %v846_v8, %v862_v9  ;;  %v659_v23 = vmax.f32 %v471_v12, 0.0  ;;  %v463_v20 = vadd.f32 %v1283_v40, %v462_v0  ;;  %v591_v45 = vadd.f32 %v1283_v40, %v590_v1 }
 0x123   :  { %891 = vst [vmem:[%s1636_s5] sm:$0xff] %v875_v16  ;;  %v876_v31 = vmax.f32 %v844_v10, %v860_v14  ;;  %v691_v46 = vmax.f32 %v599_v17, 0.0  ;;  %v474_v48 = vadd.f32 %v1033_v6, %v1283_v40  ;;  %v602_v35 = vadd.f32 %v1065_v7, %v1283_v40 }
 0x124   :  { %894 = vst [vmem:[%s1636_s5 + $0x18] sm:$0xff] %v878_v18  ;;  %v730_v39 = vmul.f32 %v1290_v47, %v659_v23  ;;  %v657_v41 = vmax.f32 %v463_v20, 0.0  ;;  %v689_v42 = vmax.f32 %v591_v45, 0.0  ;;  %v466_v43 = vadd.f32 %v1283_v40, %v465_v13 }
 0x125   :  { %892 = vst [vmem:[%s1636_s5 + $0x8] sm:$0xff] %v876_v31  ;;  %v762_v54 = vmul.f32 %v1290_v47, %v691_v46  ;;  %v660_v55 = vmax.f32 %v474_v48, 0.0  ;;  %v692_v57 = vmax.f32 %v602_v35, 0.0  ;;  %v594_v58 = vadd.f32 %v1283_v40, %v593_v15  ;;  %v1036_v59 = vpop.f32.mrb[24].mxu0  ;;  %v1068_v60 = vpop.f32.mrb[24].mxu1 }
 0x126   :  { %v801_v61 = vadd.f32 %v1302_v63, %v730_v39  ;;  %v728_v0 = vmul.f32 %v1290_v47, %v657_v41  ;;  %v760_v1 = vmul.f32 %v1290_v47, %v689_v42  ;;  %v658_v2 = vmax.f32 %v466_v43, 0.0  ;;  %v478_v3 = vpop.f32.mrb[25].mxu0  ;;  %v606_v4 = vpop.f32.mrb[25].mxu1 }
 0x127   :  { %v833_v5 = vadd.f32 %v1302_v63, %v762_v54  ;;  %v731_v6 = vmul.f32 %v1290_v47, %v660_v55  ;;  %v763_v7 = vmul.f32 %v1290_v47, %v692_v57  ;;  %v690_v11 = vmax.f32 %v594_v58, 0.0  ;;  %v1037_v8 = vpop.f32.mrb[26].mxu0  ;;  %v1069_v9 = vpop.f32.mrb[26].mxu1 }
 0x128   :  { %v849_v12 = vmax.f32 %v1349_v50, %v801_v61  ;;  %v799_v13 = vadd.f32 %v1302_v63, %v728_v0  ;;  %v831_v15 = vadd.f32 %v1302_v63, %v760_v1  ;;  %v729_v16 = vmul.f32 %v1290_v47, %v658_v2  ;;  %v481_v10 = vpop.f32.mrb[27].mxu0  ;;  %v609_v14 = vpop.f32.mrb[27].mxu1 }
 0x129   :  { %v865_v17 = vmax.f32 %v1352_v51, %v833_v5  ;;  %v802_v18 = vadd.f32 %v1302_v63, %v731_v6  ;;  %v834_v23 = vadd.f32 %v1302_v63, %v763_v7  ;;  %v761_v20 = vmul.f32 %v1290_v47, %v690_v11 }
 0x12a   :  { %v847_v45 = vmax.f32 %v1355_v52, %v799_v13  ;;  %v863_v50 = vmax.f32 %v1359_v56, %v831_v15  ;;  %v800_v31 = vadd.f32 %v1302_v63, %v729_v16  ;;  %v487_v46 = vadd.f32 %v1036_v59, %v1283_v40 }
 0x12b   :  { %v881_v48 = vmax.f32 %v849_v12, %v865_v17  ;;  %v850_v35 = vmax.f32 %v1365_v62, %v802_v18  ;;  %v866_v39 = vmax.f32 %v1379_v28, %v834_v23  ;;  %v832_v51 = vadd.f32 %v1302_v63, %v761_v20 }
 0x12c   :  { %v879_v41 = vmax.f32 %v847_v45, %v863_v50  ;;  %v848_v42 = vmax.f32 %v1382_v29, %v800_v31  ;;  %v663_v43 = vmax.f32 %v487_v46, 0.0  ;;  %v615_v54 = vadd.f32 %v1068_v60, %v1283_v40 }
 0x12d   :  { %897 = vst [vmem:[%s1636_s5 + $0x30] sm:$0xff] %v881_v48  ;;  %v882_v52 = vmax.f32 %v850_v35, %v866_v39  ;;  %v864_v56 = vmax.f32 %v1385_v30, %v832_v51  ;;  %v479_v55 = vadd.f32 %v1283_v40, %v478_v3  ;;  %v607_v62 = vadd.f32 %v1283_v40, %v606_v4  ;;  %v1040_v28 = vpop.f32.mrb[28].mxu0  ;;  %v1072_v57 = vpop.f32.mrb[28].mxu1 }
 0x12e   :  { %895 = vst [vmem:[%s1636_s5 + $0x20] sm:$0xff] %v879_v41  ;;  %v734_v29 = vmul.f32 %v1290_v47, %v663_v43  ;;  %v695_v58 = vmax.f32 %v615_v54, 0.0  ;;  %v490_v59 = vadd.f32 %v1037_v8, %v1283_v40  ;;  %v618_v60 = vadd.f32 %v1069_v9, %v1283_v40  ;;  %v494_v61 = vpop.f32.mrb[29].mxu0  ;;  %v622_v0 = vpop.f32.mrb[29].mxu1 }
 0x12f   :  { %898 = vst [vmem:[%s1636_s5 + $0x38] sm:$0xff] %v882_v52  ;;  %v880_v30 = vmax.f32 %v848_v42, %v864_v56  ;;  %v661_v1 = vmax.f32 %v479_v55, 0.0  ;;  %v693_v2 = vmax.f32 %v607_v62, 0.0  ;;  %v482_v3 = vadd.f32 %v1283_v40, %v481_v10  ;;  %v1041_v4 = vpop.f32.mrb[30].mxu0  ;;  %v1073_v5 = vpop.f32.mrb[30].mxu1 }
 0x130   :  { %v805_v6 = vadd.f32 %v1302_v63, %v734_v29  ;;  %v766_v7 = vmul.f32 %v1290_v47, %v695_v58  ;;  %v664_v11 = vmax.f32 %v490_v59, 0.0  ;;  %v696_v8 = vmax.f32 %v618_v60, 0.0  ;;  %v497_v9 = vpop.f32.mrb[31].mxu0  ;;  %v625_v12 = vpop.f32.mrb[31].mxu1 }
 0x131   :  { %896 = vst [vmem:[%s1636_s5 + $0x28] sm:$0xff] %v880_v30  ;;  %v732_v13 = vmul.f32 %v1290_v47, %v661_v1  ;;  %v764_v15 = vmul.f32 %v1290_v47, %v693_v2  ;;  %v662_v16 = vmax.f32 %v482_v3, 0.0  ;;  %v610_v10 = vadd.f32 %v1283_v40, %v609_v14 }
 0x132   :  { %v853_v17 = vmax.f32 %v1389_v32, %v805_v6  ;;  %v837_v18 = vadd.f32 %v1302_v63, %v766_v7  ;;  %v735_v23 = vmul.f32 %v1290_v47, %v664_v11  ;;  %v767_v20 = vmul.f32 %v1290_v47, %v696_v8 }
 0x133   :  { %v803_v45 = vadd.f32 %v1302_v63, %v732_v13  ;;  %v835_v50 = vadd.f32 %v1302_v63, %v764_v15  ;;  %v733_v31 = vmul.f32 %v1290_v47, %v662_v16  ;;  %v694_v46 = vmax.f32 %v610_v10, 0.0 }
 0x134   :  { %v869_v48 = vmax.f32 %v1392_v33, %v837_v18  ;;  %v806_v35 = vadd.f32 %v1302_v63, %v735_v23  ;;  %v838_v14 = vadd.f32 %v1302_v63, %v767_v20  ;;  %v503_v32 = vadd.f32 %v1040_v28, %v1283_v40 }
 0x135   :  { %v851_v39 = vmax.f32 %v1395_v34, %v803_v45  ;;  %v867_v51 = vmax.f32 %v1399_v38, %v835_v50  ;;  %v804_v41 = vadd.f32 %v1302_v63, %v733_v31  ;;  %v765_v42 = vmul.f32 %v1290_v47, %v694_v46 }
 0x136   :  { %v885_v43 = vmax.f32 %v853_v17, %v869_v48  ;;  %v854_v54 = vmax.f32 %v1405_v49, %v806_v35  ;;  %v870_v52 = vmax.f32 %v1419_v19, %v838_v14  ;;  %v667_v33 = vmax.f32 %v503_v32, 0.0 }
 0x137   :  { %v883_v56 = vmax.f32 %v851_v39, %v867_v51  ;;  %v852_v55 = vmax.f32 %v1422_v21, %v804_v41  ;;  %v836_v62 = vadd.f32 %v1302_v63, %v765_v42  ;;  %v631_v28 = vadd.f32 %v1072_v57, %v1283_v40 }
 0x138   :  { %901 = vst [vmem:[%s1636_s5 + $0x50] sm:$0xff] %v885_v43  ;;  %v886_v34 = vmax.f32 %v854_v54, %v870_v52  ;;  %v738_v38 = vmul.f32 %v1290_v47, %v667_v33  ;;  %v495_v29 = vadd.f32 %v1283_v40, %v494_v61  ;;  %v623_v49 = vadd.f32 %v1283_v40, %v622_v0 }
 0x139   :  { %899 = vst [vmem:[%s1636_s5 + $0x40] sm:$0xff] %v883_v56  ;;  %v868_v19 = vmax.f32 %v1425_v22, %v836_v62  ;;  %v699_v21 = vmax.f32 %v631_v28, 0.0  ;;  %v506_v57 = vadd.f32 %v1041_v4, %v1283_v40  ;;  %v634_v58 = vadd.f32 %v1073_v5, %v1283_v40 }
 0x13a   :  { %902 = vst [vmem:[%s1636_s5 + $0x58] sm:$0xff] %v886_v34  ;;  %v809_v59 = vadd.f32 %v1302_v63, %v738_v38  ;;  %v665_v60 = vmax.f32 %v495_v29, 0.0  ;;  %v697_v61 = vmax.f32 %v623_v49, 0.0  ;;  %v498_v0 = vadd.f32 %v1283_v40, %v497_v9 }
 0x13b   :  { %v884_v30 = vmax.f32 %v852_v55, %v868_v19  ;;  %v770_v1 = vmul.f32 %v1290_v47, %v699_v21  ;;  %v668_v2 = vmax.f32 %v506_v57, 0.0  ;;  %v700_v22 = vmax.f32 %v634_v58, 0.0 }
 0x13c   :  { %v857_v3 = vmax.f32 %v1429_v24, %v809_v59  ;;  %v736_v4 = vmul.f32 %v1290_v47, %v665_v60  ;;  %v768_v5 = vmul.f32 %v1290_v47, %v697_v61  ;;  %v666_v6 = vmax.f32 %v498_v0, 0.0 }
 0x13d   :  { %900 = vst [vmem:[%s1636_s5 + $0x48] sm:$0xff] %v884_v30  ;;  %v841_v7 = vadd.f32 %v1302_v63, %v770_v1  ;;  %v739_v11 = vmul.f32 %v1290_v47, %v668_v2  ;;  %v771_v8 = vmul.f32 %v1290_v47, %v700_v22  ;;  %v626_v9 = vadd.f32 %v1283_v40, %v625_v12 }
 0x13e   :  { %v826_v24 = vadd.f32 %v1302_v63, %v1438_v27  ;;  %v807_v13 = vadd.f32 %v1302_v63, %v736_v4  ;;  %v839_v15 = vadd.f32 %v1302_v63, %v768_v5  ;;  %v737_v16 = vmul.f32 %v1290_v47, %v666_v6 }
 0x13f   :  { %v873_v10 = vmax.f32 %v1432_v25, %v841_v7  ;;  %v810_v17 = vadd.f32 %v1302_v63, %v739_v11  ;;  %v842_v18 = vadd.f32 %v1302_v63, %v771_v8  ;;  %v698_v23 = vmax.f32 %v626_v9, 0.0 }
 0x140   :  { %v792_v20 = vadd.f32 %v1302_v63, %v1444_v37  ;;  %v855_v40 = vmax.f32 %v1435_v26, %v807_v13  ;;  %v871_v27 = vmax.f32 %v1441_v36, %v839_v15  ;;  %v808_v12 = vadd.f32 %v1302_v63, %v737_v16 }
 0x141   :  { %v889_v45 = vmax.f32 %v857_v3, %v873_v10  ;;  %v858_v50 = vmax.f32 %v1449_v44, %v810_v17  ;;  %v874_v31 = vmax.f32 %v826_v24, %v842_v18  ;;  %v769_v25 = vmul.f32 %v1290_v47, %v698_v23 }
 0x142   :  { %v887_v46 = vmax.f32 %v855_v40, %v871_v27  ;;  %v856_v48 = vmax.f32 %v792_v20, %v808_v12  ;;  %v824_v35 = vadd.f32 %v1302_v63, %v1452_v53 }
 0x143   :  { %905 = vst [vmem:[%s1636_s5 + $0x70] sm:$0xff] %v889_v45  ;;  %v890_v26 = vmax.f32 %v858_v50, %v874_v31  ;;  %v840_v36 = vadd.f32 %v1302_v63, %v769_v25 }
 0x144   :  { %903 = vst [vmem:[%s1636_s5 + $0x60] sm:$0xff] %v887_v46 }
 0x145   :  { %906 = vst [vmem:[%s1636_s5 + $0x78] sm:$0xff] %v890_v26  ;;  %v872_v47 = vmax.f32 %v824_v35, %v840_v36 }
 0x147   :  { %v888_v37 = vmax.f32 %v856_v48, %v872_v47 }
 0x149   :  { %904 = vst [vmem:[%s1636_s5 + $0x68] sm:$0xff] %v888_v37 }

// kernel: mhcnn_forward.4
= control target key start
LH: loop header
LB: loop body
LE: loop exit
PB: predicated region body
PF: predicated region fallthrough
CT: control target
= control target key end

     0   :  { %s587_s1 = inlined_call_operand.vmem [shape: bf16[128,128], index: 1, kind: input, shape index: {}]   ;;  %s588_s0 = inlined_call_operand.vmem [shape: bf16[4,32,128], index: 0, kind: input, shape index: {}]   ;;  %s589_s2 = inlined_call_operand.vmem [shape: f32[1,128], index: 2, kind: input, shape index: {}]   ;;  %s590_s3 = inlined_call_operand.vmem [shape: f32[1,128], index: 3, kind: input, shape index: {}]   ;;  %s591_s4 = inlined_call_operand.vmem [shape: f32[1,128], index: 4, kind: input, shape index: {}]   ;;  %s592_s5 = inlined_call_operand.vmem [shape: f32[32,128], index: 5, kind: output, shape index: {}]  }
   0x1   :  { %v418_v0 = vld [vmem:[%s587_s1] sm:$0xff]   ;;  %v419_v1 = vld [vmem:[%s587_s1 + $0x8] sm:$0xff]   ;;  %v420_v2 = vld [vmem:[%s587_s1 + $0x10] sm:$0xff]  }
   0x2   :  { %370 = vmatprep.subr.bf16.mxu0 %v418_v0  ;;  %402 = vmatprep.subr.bf16.mxu1 %v418_v0  ;;  %v421_v3 = vld [vmem:[%s587_s1 + $0x18] sm:$0xff]   ;;  %v426_v4 = vld [vmem:[%s588_s0] sm:$0xff]   ;;  %v423_v7 = vld [vmem:[%s587_s1 + $0x28] sm:$0xff]  }
   0x3   :  { %371 = vmatpush3.bf16.msra.mxu0 %v418_v0  ;;  %410 = vmatpush3.bf16.msra.mxu1 %v418_v0  ;;  %v427_v5 = vld [vmem:[%s588_s0 + $0x20] sm:$0xff]   ;;  %v424_v8 = vld [vmem:[%s587_s1 + $0x30] sm:$0xff]   ;;  %v425_v9 = vld [vmem:[%s587_s1 + $0x38] sm:$0xff]  }
   0x4   :  { %372 = vmatprep.subr.bf16.mxu0 %v419_v1  ;;  %403 = vmatprep.subr.bf16.mxu1 %v419_v1  ;;  %v422_v6 = vld [vmem:[%s587_s1 + $0x20] sm:$0xff]   ;;  %v428_v10 = vld [vmem:[%s588_s0 + $0x8] sm:$0xff]   ;;  %v430_v12 = vld [vmem:[%s588_s0 + $0x10] sm:$0xff]  }
   0x5   :  { %386 = vmatprep.mubr.bf16.mxu0 %v426_v4  ;;  %394 = vmatprep.mubr.bf16.mxu1 %v427_v5  ;;  %v429_v11 = vld [vmem:[%s588_s0 + $0x28] sm:$0xff]   ;;  %v431_v13 = vld [vmem:[%s588_s0 + $0x30] sm:$0xff]   ;;  %v432_v14 = vld [vmem:[%s588_s0 + $0x18] sm:$0xff]  }
   0x6   :  { %v433_v15 = vld [vmem:[%s588_s0 + $0x38] sm:$0xff]   ;;  %v515_v16 = vld [vmem:[%s589_s2] ss:$0 sm:$0xff] }
   0x7   :  { %373 = vmatpush3.bf16.msra.mxu0 %v419_v1  ;;  %411 = vmatpush3.bf16.msra.mxu1 %v419_v1  ;;  %v522_v23 = vld [vmem:[%s590_s3] ss:$0 sm:$0xff] }
   0x8   :  { %374 = vmatprep.subr.bf16.mxu0 %v420_v2  ;;  %404 = vmatprep.subr.bf16.mxu1 %v420_v2  ;;  %v531_v34 = vld [vmem:[%s591_s4] ss:$0 sm:$0xff] }
   0xb   :  { %375 = vmatpush3.bf16.msra.mxu0 %v420_v2  ;;  %412 = vmatpush3.bf16.msra.mxu1 %v420_v2 }
   0xc   :  { %376 = vmatprep.subr.bf16.mxu0 %v421_v3  ;;  %405 = vmatprep.subr.bf16.mxu1 %v421_v3 }
   0xf   :  { %377 = vmatpush3.bf16.msra.mxu0 %v421_v3  ;;  %413 = vmatpush3.bf16.msra.mxu1 %v421_v3 }
  0x10   :  { %378 = vmatprep.subr.bf16.mxu0 %v422_v6  ;;  %406 = vmatprep.subr.bf16.mxu1 %v422_v6 }
  0x13   :  { %379 = vmatpush3.bf16.msra.mxu0 %v422_v6  ;;  %414 = vmatpush3.bf16.msra.mxu1 %v422_v6 }
  0x14   :  { %380 = vmatprep.subr.bf16.mxu0 %v423_v7  ;;  %407 = vmatprep.subr.bf16.mxu1 %v423_v7 }
  0x17   :  { %381 = vmatpush3.bf16.msra.mxu0 %v423_v7  ;;  %415 = vmatpush3.bf16.msra.mxu1 %v423_v7 }
  0x18   :  { %382 = vmatprep.subr.bf16.mxu0 %v424_v8  ;;  %408 = vmatprep.subr.bf16.mxu1 %v424_v8 }
  0x1b   :  { %383 = vmatpush3.bf16.msra.mxu0 %v424_v8  ;;  %416 = vmatpush3.bf16.msra.mxu1 %v424_v8 }
  0x1c   :  { %384 = vmatprep.subr.bf16.mxu0 %v425_v9  ;;  %409 = vmatprep.subr.bf16.mxu1 %v425_v9 }
  0x1f   :  { %385 = vmatpush3.bf16.msra.mxu0 %v425_v9  ;;  %417 = vmatpush3.bf16.msra.mxu1 %v425_v9 }
  0x22   :  { %387 = vmatmul.mubr.bf16.vlgmr.msra.gmra.mrb[0].mxu0 %v428_v10  ;;  %395 = vmatmul.mubr.bf16.vlgmr.msra.gmra.mrb[0].mxu1 %v429_v11 }
  0x23   :  { %390 = vmatprep.mubr.bf16.mxu0 %v430_v12  ;;  %398 = vmatprep.mubr.bf16.mxu1 %v431_v13 }
  0x2a   :  { %391 = vmatmul.mubr.bf16.gmra.mrb[4].mxu0 %v432_v14  ;;  %399 = vmatmul.mubr.bf16.gmra.mrb[4].mxu1 %v433_v15 }
  0xf5   :  { %v388_v17 = vpop.f32.mrb[0].mxu0  ;;  %v396_v18 = vpop.f32.mrb[0].mxu1 }
  0xf6   :  { %v199_v19 = vadd.f32 %v388_v17, %v515_v16  ;;  %v231_v20 = vadd.f32 %v396_v18, %v515_v16  ;;  %v190_v21 = vpop.f32.mrb[1].mxu0  ;;  %v222_v22 = vpop.f32.mrb[1].mxu1 }
  0xf7   :  { %v191_v24 = vadd.f32 %v515_v16, %v190_v21  ;;  %v223_v25 = vadd.f32 %v515_v16, %v222_v22  ;;  %v389_v26 = vpop.f32.mrb[2].mxu0  ;;  %v397_v27 = vpop.f32.mrb[2].mxu1 }
  0xf8   :  { %v255_v28 = vmax.f32 %v199_v19, 0.0  ;;  %v263_v29 = vmax.f32 %v231_v20, 0.0  ;;  %v202_v30 = vadd.f32 %v389_v26, %v515_v16  ;;  %v234_v31 = vadd.f32 %v397_v27, %v515_v16  ;;  %v193_v32 = vpop.f32.mrb[3].mxu0  ;;  %v225_v33 = vpop.f32.mrb[3].mxu1 }
  0xf9   :  { %v253_v35 = vmax.f32 %v191_v24, 0.0  ;;  %v261_v36 = vmax.f32 %v223_v25, 0.0  ;;  %v194_v37 = vadd.f32 %v515_v16, %v193_v32  ;;  %v226_v38 = vadd.f32 %v515_v16, %v225_v33 }
  0xfa   :  { %v278_v39 = vmul.f32 %v522_v23, %v255_v28  ;;  %v286_v40 = vmul.f32 %v522_v23, %v263_v29  ;;  %v256_v41 = vmax.f32 %v202_v30, 0.0  ;;  %v264_v42 = vmax.f32 %v234_v31, 0.0 }
  0xfb   :  { %v276_v43 = vmul.f32 %v522_v23, %v253_v35  ;;  %v284_v44 = vmul.f32 %v522_v23, %v261_v36  ;;  %v254_v45 = vmax.f32 %v194_v37, 0.0  ;;  %v262_v46 = vmax.f32 %v226_v38, 0.0 }
  0xfc   :  { %v301_v47 = vadd.f32 %v531_v34, %v278_v39  ;;  %v309_v48 = vadd.f32 %v531_v34, %v286_v40  ;;  %v279_v49 = vmul.f32 %v522_v23, %v256_v41  ;;  %v287_v50 = vmul.f32 %v522_v23, %v264_v42 }
  0xfd   :  { %v299_v51 = vadd.f32 %v531_v34, %v276_v43  ;;  %v307_v52 = vadd.f32 %v531_v34, %v284_v44  ;;  %v277_v53 = vmul.f32 %v522_v23, %v254_v45  ;;  %v285_v54 = vmul.f32 %v522_v23, %v262_v46  ;;  %v392_v55 = vpop.f32.mrb[4].mxu0  ;;  %v400_v56 = vpop.f32.mrb[4].mxu1 }
  0xfe   :  { %v302_v57 = vadd.f32 %v531_v34, %v279_v49  ;;  %v310_v58 = vadd.f32 %v531_v34, %v287_v50  ;;  %v215_v59 = vadd.f32 %v392_v55, %v515_v16  ;;  %v247_v60 = vadd.f32 %v400_v56, %v515_v16  ;;  %v206_v61 = vpop.f32.mrb[5].mxu0  ;;  %v238_v62 = vpop.f32.mrb[5].mxu1 }
  0xff   :  { %v300_v63 = vadd.f32 %v531_v34, %v277_v53  ;;  %v308_v0 = vadd.f32 %v531_v34, %v285_v54  ;;  %v207_v1 = vadd.f32 %v515_v16, %v206_v61  ;;  %v239_v2 = vadd.f32 %v515_v16, %v238_v62  ;;  %v393_v3 = vpop.f32.mrb[6].mxu0  ;;  %v401_v4 = vpop.f32.mrb[6].mxu1 }
 0x100   :  { %v259_v5 = vmax.f32 %v215_v59, 0.0  ;;  %v267_v6 = vmax.f32 %v247_v60, 0.0  ;;  %v218_v7 = vadd.f32 %v393_v3, %v515_v16  ;;  %v250_v8 = vadd.f32 %v401_v4, %v515_v16  ;;  %v209_v9 = vpop.f32.mrb[7].mxu0  ;;  %v241_v10 = vpop.f32.mrb[7].mxu1 }
 0x101   :  { %v257_v11 = vmax.f32 %v207_v1, 0.0  ;;  %v265_v12 = vmax.f32 %v239_v2, 0.0  ;;  %v210_v13 = vadd.f32 %v515_v16, %v209_v9  ;;  %v242_v14 = vadd.f32 %v515_v16, %v241_v10 }
 0x102   :  { %v282_v15 = vmul.f32 %v522_v23, %v259_v5  ;;  %v290_v17 = vmul.f32 %v522_v23, %v267_v6  ;;  %v260_v18 = vmax.f32 %v218_v7, 0.0  ;;  %v268_v19 = vmax.f32 %v250_v8, 0.0 }
 0x103   :  { %v280_v20 = vmul.f32 %v522_v23, %v257_v11  ;;  %v288_v21 = vmul.f32 %v522_v23, %v265_v12  ;;  %v258_v22 = vmax.f32 %v210_v13, 0.0  ;;  %v266_v24 = vmax.f32 %v242_v14, 0.0 }
 0x104   :  { %v305_v25 = vadd.f32 %v531_v34, %v282_v15  ;;  %v313_v26 = vadd.f32 %v531_v34, %v290_v17  ;;  %v283_v27 = vmul.f32 %v522_v23, %v260_v18  ;;  %v291_v16 = vmul.f32 %v522_v23, %v268_v19 }
 0x105   :  { %v303_v28 = vadd.f32 %v531_v34, %v280_v20  ;;  %v311_v29 = vadd.f32 %v531_v34, %v288_v21  ;;  %v281_v30 = vmul.f32 %v522_v23, %v258_v22  ;;  %v289_v31 = vmul.f32 %v522_v23, %v266_v24 }
 0x106   :  { %v317_v32 = vmax.f32 %v301_v47, %v305_v25  ;;  %v321_v33 = vmax.f32 %v309_v48, %v313_v26  ;;  %v306_v35 = vadd.f32 %v531_v34, %v283_v27  ;;  %v314_v36 = vadd.f32 %v531_v34, %v291_v16 }
 0x107   :  { %v315_v37 = vmax.f32 %v299_v51, %v303_v28  ;;  %v319_v38 = vmax.f32 %v307_v52, %v311_v29  ;;  %v304_v39 = vadd.f32 %v531_v34, %v281_v30  ;;  %v312_v40 = vadd.f32 %v531_v34, %v289_v31 }
 0x108   :  { %v325_v41 = vmax.f32 %v317_v32, %v321_v33  ;;  %v318_v42 = vmax.f32 %v302_v57, %v306_v35  ;;  %v322_v43 = vmax.f32 %v310_v58, %v314_v36 }
 0x109   :  { %v323_v44 = vmax.f32 %v315_v37, %v319_v38  ;;  %v316_v45 = vmax.f32 %v300_v63, %v304_v39  ;;  %v320_v46 = vmax.f32 %v308_v0, %v312_v40 }
 0x10a   :  { %329 = vst [vmem:[%s592_s5 + $0x10] sm:$0xff] %v325_v41  ;;  %v326_v23 = vmax.f32 %v318_v42, %v322_v43 }
 0x10b   :  { %327 = vst [vmem:[%s592_s5] sm:$0xff] %v323_v44  ;;  %v324_v47 = vmax.f32 %v316_v45, %v320_v46 }
 0x10c   :  { %330 = vst [vmem:[%s592_s5 + $0x18] sm:$0xff] %v326_v23 }
 0x10d   :  { %328 = vst [vmem:[%s592_s5 + $0x8] sm:$0xff] %v324_v47 }

// kernel: mhcnn_forward.5
= control target key start
LH: loop header
LB: loop body
LE: loop exit
PB: predicated region body
PF: predicated region fallthrough
CT: control target
= control target key end

     0   :  { %v803_v31 = vmov 0   ;;  %vm273_vm0 = vcmask 1043456   ;;  %vm325_vm1 = vcmask 1041409   ;;  %s1028_s1 = inlined_call_operand.vmem [shape: bf16[256,128], index: 1, kind: input, shape index: {}]   ;;  %s1029_s0 = inlined_call_operand.vmem [shape: bf16[4,8,256], index: 0, kind: input, shape index: {}]   ;;  %s1030_s5 = inlined_call_operand.vmem [shape: bf16[128,256], index: 5, kind: input, shape index: {}]   ;;  %s1031_s7 = inlined_call_operand.vmem [shape: bf16[256,128], index: 7, kind: input, shape index: {}]   ;;  %s1032_s2 = inlined_call_operand.vmem [shape: f32[1,128], index: 2, kind: input, shape index: {}]   ;;  %s1033_s3 = inlined_call_operand.vmem [shape: f32[1,128], index: 3, kind: input, shape index: {}]   ;;  %s1034_s4 = inlined_call_operand.vmem [shape: f32[1,128], index: 4, kind: input, shape index: {}]   ;;  %s1035_s6 = inlined_call_operand.vmem [shape: f32[1,256], index: 6, kind: input, shape index: {}]   ;;  %s1036_s8 = inlined_call_operand.vmem [shape: f32[1,128], index: 8, kind: input, shape index: {}]   ;;  %s1037_s9 = inlined_call_operand.vmem [shape: f32[2,128], index: 9, kind: output, shape index: {}]  }
   0x1   :  { %v741_v0 = vld [vmem:[%s1028_s1 + $0x40] sm:$0xff]   ;;  %v743_v2 = vld [vmem:[%s1028_s1 + $0x48] sm:$0xff]   ;;  %v745_v4 = vld [vmem:[%s1028_s1 + $0x50] sm:$0xff]   ;;  %441 = vmatprep.mubr.bf16.mxu1 %v803_v31 }
   0x2   :  { %v742_v1 = vld [vmem:[%s1028_s1] sm:$0xff]   ;;  %690 = vmatprep.subr.bf16.mxu0 %v741_v0  ;;  %v744_v3 = vld [vmem:[%s1028_s1 + $0x8] sm:$0xff]   ;;  %v746_v5 = vld [vmem:[%s1028_s1 + $0x10] sm:$0xff]  }
   0x3   :  { %691 = vmatpush3.bf16.msra.mxu0 %v742_v1  ;;  %v747_v6 = vld [vmem:[%s1028_s1 + $0x58] sm:$0xff]   ;;  %v749_v8 = vld [vmem:[%s1028_s1 + $0x60] sm:$0xff]   ;;  %v751_v10 = vld [vmem:[%s1028_s1 + $0x68] sm:$0xff]  }
   0x4   :  { %692 = vmatprep.subr.bf16.mxu0 %v743_v2  ;;  %v748_v7 = vld [vmem:[%s1028_s1 + $0x18] sm:$0xff]   ;;  %v750_v9 = vld [vmem:[%s1028_s1 + $0x20] sm:$0xff]   ;;  %v752_v12 = vld [vmem:[%s1028_s1 + $0x28] sm:$0xff]  }
   0x5   :  { %v759_v11 = vld [vmem:[%s1029_s0 + $0x4] ss:$8 sps:$4 sm:$0xff]   ;;  %v753_v13 = vld [vmem:[%s1028_s1 + $0x70] sm:$0xff]   ;;  %v755_v15 = vld [vmem:[%s1028_s1 + $0x78] sm:$0xff]  }
   0x6   :  { %224 = vmatprep.mubr.bf16.mxu0 %v759_v11  ;;  %v754_v14 = vld [vmem:[%s1028_s1 + $0x30] sm:$0xff]   ;;  %v756_v16 = vld [vmem:[%s1028_s1 + $0x38] sm:$0xff]   ;;  %v757_v17 = vld [vmem:[%s1029_s0] ss:$8 sps:$4 sm:$0xff]  }
   0x7   :  { %693 = vmatpush3.bf16.msra.mxu0 %v744_v3  ;;  %v760_v18 = vld [vmem:[%s1029_s0 + $0x14] ss:$8 sps:$4 sm:$0xff]   ;;  %v762_v19 = vld [vmem:[%s1029_s0 + $0x10] ss:$8 sps:$4 sm:$0xff]   ;;  %v763_v20 = vld [vmem:[%s1030_s5 + $0x4] ss:$8 sps:$4 sm:$0xff]  }
   0x8   :  { %694 = vmatprep.subr.bf16.mxu0 %v745_v4  ;;  %v765_v21 = vld [vmem:[%s1030_s5] ss:$8 sps:$4 sm:$0xff]   ;;  %409 = vmatprep.subr.bf16.mxu1 %v763_v20  ;;  %v766_v22 = vld [vmem:[%s1030_s5 + $0x14] ss:$8 sps:$4 sm:$0xff]   ;;  %v768_v23 = vld [vmem:[%s1030_s5 + $0x10] ss:$8 sps:$4 sm:$0xff]  }
   0x9   :  { %410 = vmatpush1.bf16.msra.mxu1 %v765_v21  ;;  %v769_v24 = vld [vmem:[%s1030_s5 + $0x24] ss:$8 sps:$4 sm:$0xff]   ;;  %v771_v25 = vld [vmem:[%s1030_s5 + $0x20] ss:$8 sps:$4 sm:$0xff]   ;;  %v772_v26 = vld [vmem:[%s1030_s5 + $0x34] ss:$8 sps:$4 sm:$0xff]  }
   0xa   :  { %411 = vmatprep.subr.bf16.mxu1 %v766_v22  ;;  %v774_v27 = vld [vmem:[%s1030_s5 + $0x30] ss:$8 sps:$4 sm:$0xff]   ;;  %v775_v28 = vld [vmem:[%s1030_s5 + $0x44] ss:$8 sps:$4 sm:$0xff]   ;;  %v777_v29 = vld [vmem:[%s1030_s5 + $0x40] ss:$8 sps:$4 sm:$0xff]  }
   0xb   :  { %695 = vmatpush3.bf16.msra.mxu0 %v746_v5  ;;  %v778_v30 = vld [vmem:[%s1030_s5 + $0x54] ss:$8 sps:$4 sm:$0xff]   ;;  %v780_v32 = vld [vmem:[%s1030_s5 + $0x50] ss:$8 sps:$4 sm:$0xff]   ;;  %v781_v33 = vld [vmem:[%s1030_s5 + $0x64] ss:$8 sps:$4 sm:$0xff]  }
   0xc   :  { %696 = vmatprep.subr.bf16.mxu0 %v747_v6  ;;  %v783_v34 = vld [vmem:[%s1030_s5 + $0x60] ss:$8 sps:$4 sm:$0xff]   ;;  %v784_v35 = vld [vmem:[%s1030_s5 + $0x74] ss:$8 sps:$4 sm:$0xff]   ;;  %v786_v36 = vld [vmem:[%s1030_s5 + $0x70] ss:$8 sps:$4 sm:$0xff]  }
   0xd   :  { %412 = vmatpush1.bf16.msra.mxu1 %v768_v23  ;;  %v787_v37 = vld [vmem:[%s1031_s7 + $0x40] sm:$0xff]   ;;  %v789_v39 = vld [vmem:[%s1031_s7 + $0x48] sm:$0xff]   ;;  %v791_v41 = vld [vmem:[%s1031_s7 + $0x50] sm:$0xff]  }
   0xe   :  { %413 = vmatprep.subr.bf16.mxu1 %v769_v24  ;;  %v788_v38 = vld [vmem:[%s1031_s7] sm:$0xff]   ;;  %v790_v40 = vld [vmem:[%s1031_s7 + $0x8] sm:$0xff]   ;;  %v792_v42 = vld [vmem:[%s1031_s7 + $0x10] sm:$0xff]  }
   0xf   :  { %697 = vmatpush3.bf16.msra.mxu0 %v748_v7  ;;  %v793_v43 = vld [vmem:[%s1031_s7 + $0x58] sm:$0xff]   ;;  %v795_v45 = vld [vmem:[%s1031_s7 + $0x60] sm:$0xff]   ;;  %v797_v47 = vld [vmem:[%s1031_s7 + $0x68] sm:$0xff]  }
  0x10   :  { %698 = vmatprep.subr.bf16.mxu0 %v749_v8  ;;  %v794_v44 = vld [vmem:[%s1031_s7 + $0x18] sm:$0xff]   ;;  %v796_v46 = vld [vmem:[%s1031_s7 + $0x20] sm:$0xff]   ;;  %v798_v48 = vld [vmem:[%s1031_s7 + $0x28] sm:$0xff]  }
  0x11   :  { %414 = vmatpush1.bf16.msra.mxu1 %v771_v25  ;;  %v634_v50 = vld [vmem:[%s1032_s2] ss:$0 sm:$0xff] }
  0x12   :  { %415 = vmatprep.subr.bf16.mxu1 %v772_v26  ;;  %v655_v57 = vld [vmem:[%s1033_s3] ss:$0 sm:$0xff] }
  0x13   :  { %699 = vmatpush3.bf16.msra.mxu0 %v750_v9  ;;  %v656_v63 = vld [vmem:[%s1034_s4] ss:$0 sm:$0xff] }
  0x14   :  { %700 = vmatprep.subr.bf16.mxu0 %v751_v10 }
  0x15   :  { %416 = vmatpush1.bf16.msra.mxu1 %v774_v27 }
  0x16   :  { %417 = vmatprep.subr.bf16.mxu1 %v775_v28 }
  0x17   :  { %701 = vmatpush3.bf16.msra.mxu0 %v752_v12 }
  0x18   :  { %702 = vmatprep.subr.bf16.mxu0 %v753_v13 }
  0x19   :  { %418 = vmatpush1.bf16.msra.mxu1 %v777_v29 }
  0x1a   :  { %419 = vmatprep.subr.bf16.mxu1 %v778_v30 }
  0x1b   :  { %703 = vmatpush3.bf16.msra.mxu0 %v754_v14 }
  0x1c   :  { %704 = vmatprep.subr.bf16.mxu0 %v755_v15 }
  0x1d   :  { %420 = vmatpush1.bf16.msra.mxu1 %v780_v32 }
  0x1e   :  { %421 = vmatprep.subr.bf16.mxu1 %v781_v33 }
  0x1f   :  { %705 = vmatpush3.bf16.msra.mxu0 %v756_v16 }
  0x20   :  { %718 = vmatprep.subr.bf16.mxu0 %v787_v37 }
  0x21   :  { %422 = vmatpush1.bf16.msra.mxu1 %v783_v34 }
  0x22   :  { %225 = vmatmul.mubr.bf16.vlgmr.msra.gmra.mrb[0].mxu0 %v757_v17  ;;  %423 = vmatprep.subr.bf16.mxu1 %v784_v35 }
  0x23   :  { %232 = vmatprep.mubr.bf16.mxu0 %v760_v18  ;;  %719 = vmatpush3.bf16.msra.mxu0 %v788_v38 }
  0x24   :  { %720 = vmatprep.subr.bf16.mxu0 %v789_v39 }
  0x25   :  { %424 = vmatpush1.bf16.msra.mxu1 %v786_v36 }
  0x27   :  { %721 = vmatpush3.bf16.msra.mxu0 %v790_v40 }
  0x28   :  { %722 = vmatprep.subr.bf16.mxu0 %v791_v41 }
  0x2a   :  { %233 = vmatmul.mubr.bf16.gmra.mrb[4].mxu0 %v762_v19 }
  0x2b   :  { %723 = vmatpush3.bf16.msra.mxu0 %v792_v42  ;;  %v799_v42 = vld [vmem:[%s1031_s7 + $0x70] sm:$0xff]  }
  0x2c   :  { %724 = vmatprep.subr.bf16.mxu0 %v793_v43  ;;  %v800_v43 = vld [vmem:[%s1031_s7 + $0x30] sm:$0xff]  }
  0x2f   :  { %725 = vmatpush3.bf16.msra.mxu0 %v794_v44  ;;  %v801_v44 = vld [vmem:[%s1031_s7 + $0x78] sm:$0xff]  }
  0x30   :  { %726 = vmatprep.subr.bf16.mxu0 %v795_v45  ;;  %v802_v45 = vld [vmem:[%s1031_s7 + $0x38] sm:$0xff]  }
  0x33   :  { %727 = vmatpush3.bf16.msra.mxu0 %v796_v46  ;;  %v311_v46 = vlaneseq }
  0x34   :  { %728 = vmatprep.subr.bf16.mxu0 %v797_v47 }
  0x35   :  { %v312_v47 = vshrl.u32 %v311_v46, 7 }
  0x37   :  { %729 = vmatpush3.bf16.msra.mxu0 %v798_v48  ;;  %v313_v48 = vsub.s32 0, %v312_v47 }
  0x38   :  { %730 = vmatprep.subr.bf16.mxu0 %v799_v42 }
  0x3b   :  { %731 = vmatpush3.bf16.msra.mxu0 %v800_v43 }
  0x3c   :  { %732 = vmatprep.subr.bf16.mxu0 %v801_v44 }
  0x3f   :  { %733 = vmatpush3.bf16.msra.mxu0 %v802_v45 }
  0xf5   :  { %v706_v49 = vpop.f32.mrb[0].mxu0 }
  0xf6   :  { %v707_v51 = vpop.f32.mrb[1].mxu0 }
  0xf7   :  { %v708_v52 = vadd.f32 %v707_v51, %v706_v49  ;;  %v709_v53 = vpop.f32.mrb[2].mxu0  ;;  %v309_v49 = vld [vmem:[%s1035_s6] sm:$0x3] }
  0xf8   :  { %v710_v54 = vpop.f32.mrb[3].mxu0  ;;  %v314_v51 = vrot.slane %v309_v49, %v313_v48 }
  0xf9   :  { %v227_v55 = vadd.f32 %v708_v52, %v634_v50  ;;  %v711_v56 = vadd.f32 %v710_v54, %v709_v53 }
  0xfb   :  { %v241_v58 = vmax.f32 %v227_v55, 0.0  ;;  %v230_v59 = vadd.f32 %v711_v56, %v634_v50 }
  0xfd   :  { %v252_v60 = vmul.f32 %v655_v57, %v241_v58  ;;  %v242_v61 = vmax.f32 %v230_v59, 0.0  ;;  %v712_v62 = vpop.f32.mrb[4].mxu0 }
  0xfe   :  { %v713_v0 = vpop.f32.mrb[5].mxu0 }
  0xff   :  { %v253_v1 = vmul.f32 %v655_v57, %v242_v61  ;;  %v714_v2 = vadd.f32 %v713_v0, %v712_v62  ;;  %v715_v3 = vpop.f32.mrb[6].mxu0  ;;  %v263_v5 = vadd.f32 %v656_v63, %v252_v60  ;;  %v673_v0 = vld [vmem:[%s1036_s8] ss:$0 sm:$0xff] }
 0x100   :  { %v716_v4 = vpop.f32.mrb[7].mxu0 }
 0x101   :  { %v264_v6 = vadd.f32 %v656_v63, %v253_v1  ;;  %v235_v7 = vadd.f32 %v714_v2, %v634_v50  ;;  %v717_v8 = vadd.f32 %v716_v4, %v715_v3 }
 0x103   :  { %v267_v9 = vmax.f32 %v263_v5, %v264_v6  ;;  %v243_v10 = vmax.f32 %v235_v7, 0.0  ;;  %v238_v11 = vadd.f32 %v717_v8, %v634_v50  ;;  %v317_v50 = vsub.s32 1, %v312_v47 }
 0x105   :  { %v254_v12 = vmul.f32 %v655_v57, %v243_v10  ;;  %v244_v13 = vmax.f32 %v238_v11, 0.0  ;;  %v318_v52 = vrot.slane %v309_v49, %v317_v50 }
 0x107   :  { %v255_v14 = vmul.f32 %v655_v57, %v244_v13  ;;  %v265_v15 = vadd.f32 %v656_v63, %v254_v12 }
 0x109   :  { %v266_v16 = vadd.f32 %v656_v63, %v255_v14 }
 0x10b   :  { %v268_v17 = vmax.f32 %v265_v15, %v266_v16 }
 0x10d   :  { %v269_v18 = vmax.f32 %v267_v9, %v268_v17 }
 0x10f   :  { %v271_v19 = vcombine.high %v269_v18, %v269_v18  ;;  %v274_v20 = vsel %vm273_vm0, %v269_v18, 0.0 }
 0x110   :  { %v275_v21 = vrot.slane %v274_v20, 4 }
 0x111   :  { %v281_v22 = vsel %vm273_vm0, %v271_v19, 0.0 }
 0x112   :  { %v276_v23 = vadd.f32 %v275_v21, %v274_v20  ;;  %v282_v24 = vrot.slane %v281_v22, 4 }
 0x114   :  { %v277_v25 = vrot.slane %v276_v23, 2  ;;  %v283_v26 = vadd.f32 %v282_v24, %v281_v22 }
 0x116   :  { %v278_v27 = vadd.f32 %v277_v25, %v276_v23  ;;  %v284_v28 = vrot.slane %v283_v26, 2 }
 0x118   :  { %v279_v29 = vrot.slane %v278_v27, 1  ;;  %v285_v30 = vadd.f32 %v284_v28, %v283_v26 }
 0x11a   :  { %v280_v31 = vadd.f32 %v279_v29, %v278_v27  ;;  %v286_v32 = vrot.slane %v285_v30, 1 }
 0x11c   :  { %v287_v33 = vadd.f32 %v286_v32, %v285_v30  ;;  %v289_v34 = vmul.f32 0.25, %v280_v31 }
 0x11e   :  { %v290_v35 = vmul.f32 0.25, %v287_v33  ;;  %v291_v36 = vpack.c.bf16 %v289_v34, %v289_v34 }
 0x120   :  { %v292_v37 = vpack.c.bf16 %v290_v35, %v290_v35  ;;  %v323_v38 = vunpack.c.l.b16 %v291_v36 }
 0x122   :  { %v324_v39 = vunpack.c.l.b16 %v292_v37 }
 0x124   :  { %v326_v40 = vsel %vm325_vm1, %v324_v39, %v323_v38 }
 0x125   :  { %v327_v41 = vpack.c.b16 %v326_v40, %v326_v40 }
 0x127   :  { %442 = vmatmul.mubr.bf16.vlgmr.msra.gmra.mrb[0].mxu1 %v327_v41 }
 0x1fa   :  { %v443_v53 = vpop.f32.mrb[0].mxu1 }
 0x1fb   :  { %v444_v54 = vadd.f32 %v443_v53, %v314_v51  ;;  %v445_v55 = vpop.f32.mrb[1].mxu1 }
 0x1fc   :  { %v446_v56 = vadd.f32 %v445_v55, %v318_v52  ;;  %v447_v57 = vpop.f32.mrb[2].mxu1 }
 0x1fd   :  { %v450_v58 = vmax.f32 %v444_v54, 0.0  ;;  %v448_v59 = vpop.f32.mrb[3].mxu1 }
 0x1fe   :  { %v451_v60 = vmax.f32 %v446_v56, 0.0 }
 0x1ff   :  { %v452_v62 = vpack.c.bf16 %v450_v58, %v450_v58 }
 0x200   :  { %v453_v61 = vpack.c.bf16 %v451_v60, %v451_v60 }
 0x202   :  { %621 = vmatprep.mubr.bf16.mxu0 %v453_v61 }
 0x203   :  { %622 = vmatmul.mubr.bf16.vlgmr.msra.gmra.mrb[8].mxu0 %v452_v62 }
 0x2d6   :  { %v734_v63 = vpop.f32.mrb[8].mxu0 }
 0x2d7   :  { %v735_v1 = vpop.f32.mrb[9].mxu0 }
 0x2d8   :  { %v736_v2 = vadd.f32 %v735_v1, %v734_v63  ;;  %v737_v3 = vpop.f32.mrb[10].mxu0 }
 0x2d9   :  { %v738_v4 = vpop.f32.mrb[11].mxu0 }
 0x2da   :  { %v624_v5 = vadd.f32 %v736_v2, %v673_v0 }
 0x2dc   :  { %629 = vst [vmem:[%s1037_s9] sm:$0x3] %v624_v5 }

</bundles_post_ra>
